<compile_context>
chip_gen: v6e
topology: v6e:2x2x1
jax: 0.10.0
libtpu: 0.0.40
codegen_flags: <defaults>
</compile_context>

<pallas_src>
import jax
import jax.numpy as jnp
from jax.experimental import pallas as pl
from jax.experimental.pallas import tpu as pltpu

C_OUT = 66
CPAD = 128               # channel dim zero-padded to a full 128-lane tile
KH = KW = 7
H = W = 28
PH = PW = 14
NPOOL = PH * PW          # 196 pooled pixels
NPOOL_PAD = 208          # padded to a multiple of 16 (bf16 sublane tile safe)
KK = KH * KW             # 49 conv taps
NCLASS = 10
FEAT = C_OUT * NPOOL     # 12936 (PyTorch flatten size)
NSUB = 4                 # 2x2 pooling sub-pixels


def fused_cnn_kernel(p_ref, w_ref, b_ref, wfc_ref, bfc_ref, o_ref):
    # p_ref:   (4, BB*208, 49) bf16  im2col patches, dim0 = pooling sub-pixel
    # w_ref:   (49, 128)       bf16  conv weight, channels zero-padded 66 -> 128
    # b_ref:   (1, 128)        f32   conv bias, zero-padded
    # wfc_ref: (10, 208, 128)  f32   FC weight (class, pooled_pixel, channel),
    #                                zero rows for padded pixels / channels
    # bfc_ref: (1, 10)         f32   FC bias
    # o_ref:   (BB, 1, 10)     f32   logits
    BB = o_ref.shape[0]

    # Conv as one MXU matmul per pooling sub-pixel, max-accumulated so the full
    # conv map for all 4 sub-pixels is never materialized at once.
    pooled = jnp.dot(p_ref[0], w_ref[...], preferred_element_type=jnp.float32)
    for s in range(1, NSUB):
        ms = jnp.dot(p_ref[s], w_ref[...], preferred_element_type=jnp.float32)
        pooled = jnp.maximum(pooled, ms)                       # (BB*208, 128)

    # Bias + ReLU commute with the monotone max.  NOTE: padded pixel rows
    # evaluate to ReLU(bias) != 0 here; they are cancelled exactly by the zero
    # rows in wfc_ref (do not change one without the other).
    feat = jnp.maximum(pooled.reshape(BB, NPOOL_PAD, CPAD) + b_ref[...], 0.0)

    # Fully-connected layer: per-class multiply, reduce the pooled-pixel axis
    # FIRST (VALU vreg adds + one sublane reduce), then one lane reduce.
    cols = []
    for k in range(NCLASS):
        prod = feat * wfc_ref[k]                               # (BB, 208, 128)
        s = jnp.sum(prod, axis=1, keepdims=True)               # (BB, 1, 128)
        cols.append(jnp.sum(s, axis=2, keepdims=True))         # (BB, 1, 1)
    logits = jnp.concatenate(cols, axis=2)                     # (BB, 1, 10)
    o_ref[...] = logits + bfc_ref[...]


def im2col_pool_order(x):
    """x: (B, 1, 28, 28) f32 -> (4, B*208, 49) bf16 patches, sub-pixel major."""
    B = x.shape[0]
    x_pad = jnp.pad(x[:, 0], ((0, 0), (3, 3), (3, 3)))         # (B, 34, 34)
    groups = []
    for dy in range(2):
        for dx in range(2):
            taps = []
            for kh in range(KH):
                for kw in range(KW):
                    sub = x_pad[:, dy + kh:dy + kh + H:2, dx + kw:dx + kw + W:2]
                    taps.append(sub.reshape(B, NPOOL))          # (B, 196)
            g = jnp.stack(taps, axis=-1)                         # (B, 196, 49)
            g = jnp.pad(g, ((0, 0), (0, NPOOL_PAD - NPOOL), (0, 0)))
            groups.append(g.reshape(B * NPOOL_PAD, KK))          # (B*208, 49)
    return jnp.stack(groups, axis=0).astype(jnp.bfloat16)        # (4, B*208, 49)


def cnn_shallow_forward(x, conv_w, conv_b, fc_w, fc_b, *, block_b=16):
    B = x.shape[0]
    # Cap BB at B//2 so there are >= 2 grid steps whenever B >= 2 (lets v7x
    # shard the "parallel" batch axis over its two TensorCores).
    BB = max(1, min(block_b, B // 2))
    Bp = ((B + BB - 1) // BB) * BB
    x = x.astype(jnp.float32)
    if Bp != B:
        x = jnp.pad(x, ((0, Bp - B), (0, 0), (0, 0), (0, 0)))

    patches = im2col_pool_order(x)                              # (4, Bp*208, 49) bf16

    # Conv weight / bias, channel-padded to 128 lanes (weight in bf16 for MXU).
    w_mat = jnp.pad(conv_w.reshape(C_OUT, KK).T,
                    ((0, 0), (0, CPAD - C_OUT))).astype(jnp.bfloat16)
    b_mat = jnp.pad(conv_b.reshape(1, C_OUT), ((0, 0), (0, CPAD - C_OUT)))

    # FC weight -> (class, pooled_pixel, channel) matching the channel-last
    # feature layout; zero-pad so padded pixels/channels contribute exactly 0.
    w_fc3 = fc_w.reshape(NCLASS, C_OUT, NPOOL).transpose(0, 2, 1)   # (10,196,66)
    w_fc3 = jnp.pad(w_fc3, ((0, 0), (0, NPOOL_PAD - NPOOL), (0, CPAD - C_OUT)))
    b_fc = fc_b.reshape(1, NCLASS)

    out = pl.pallas_call(
        fused_cnn_kernel,
        out_shape=jax.ShapeDtypeStruct((Bp, 1, NCLASS), jnp.float32),
        grid_spec=pltpu.PrefetchScalarGridSpec(
            num_scalar_prefetch=0,
            grid=(Bp // BB,),
            in_specs=[
                pl.BlockSpec((NSUB, BB * NPOOL_PAD, KK), lambda b: (0, b, 0)),
                pl.BlockSpec((KK, CPAD), lambda b: (0, 0)),
                pl.BlockSpec((1, CPAD), lambda b: (0, 0)),
                pl.BlockSpec((NCLASS, NPOOL_PAD, CPAD), lambda b: (0, 0, 0)),
                pl.BlockSpec((1, NCLASS), lambda b: (0, 0)),
            ],
            out_specs=pl.BlockSpec((BB, 1, NCLASS), lambda b: (b, 0, 0)),
        ),
        compiler_params=pltpu.CompilerParams(
            dimension_semantics=("parallel",),
            vmem_limit_bytes=32 * 1024 * 1024,
        ),
    )(patches, w_mat, b_mat, w_fc3, b_fc)
    return out[:B, 0, :]


def reference_forward(x, conv_w, conv_b, fc_w, fc_b):
    # Pure-JAX replica of the PyTorch forward (NCHW, f32) for parity checking.
    y = jax.lax.conv_general_dilated(
        x.astype(jnp.float32), conv_w, window_strides=(1, 1),
        padding=((3, 3), (3, 3)), dimension_numbers=("NCHW", "OIHW", "NCHW"))
    y = jnp.maximum(y + conv_b[None, :, None, None], 0.0)
    y = jax.lax.reduce_window(y, -jnp.inf, jax.lax.max,
                              (1, 1, 2, 2), (1, 1, 2, 2), "VALID")
    y = y.reshape(x.shape[0], -1)
    return y @ fc_w.T + fc_b


if __name__ == "__main__":
    B = 2
    key = jax.random.PRNGKey(0)
    kx, kw1, kb1, kw2, kb2 = jax.random.split(key, 5)

    # Input consistent with the module: Conv2d(1,...) + Linear(66*14*14) -> 28x28 images.
    x = jax.random.normal(kx, (B, 1, H, W), dtype=jnp.float32)

    # Deterministic synthetic parameters (PyTorch shapes).
    conv_w = jax.random.normal(kw1, (C_OUT, 1, KH, KW), dtype=jnp.float32) * 0.05
    conv_b = jax.random.normal(kb1, (C_OUT,), dtype=jnp.float32) * 0.05
    fc_w = jax.random.normal(kw2, (NCLASS, FEAT), dtype=jnp.float32) * 0.01
    fc_b = jax.random.normal(kb2, (NCLASS,), dtype=jnp.float32) * 0.01

    out = cnn_shallow_forward(x, conv_w, conv_b, fc_w, fc_b)
    out = jax.block_until_ready(out)

    ref = jax.block_until_ready(reference_forward(x, conv_w, conv_b, fc_w, fc_b))
    assert out.shape == (B, NCLASS) and out.dtype == jnp.float32
    # 5e-3 tolerance covers bf16 quantization of the im2col patches / conv
    # weight (accumulation stays f32); typical max abs diff is ~1e-3.
    assert jnp.allclose(out, ref, atol=5e-3, rtol=5e-3), \
        f"max abs diff {float(jnp.max(jnp.abs(out - ref)))}"

    print("KERNEL_OK")
</pallas_src>

<mosaic_0001>
module attributes {stable_mosaic.version = 11 : i64} {
  func.func @fused_cnn_kernel(%arg0: i32, %arg1: memref<4x208x49xbf16, #tpu.memory_space<vmem>>, %arg2: memref<49x128xbf16, #tpu.memory_space<vmem>>, %arg3: memref<1x128xf32, #tpu.memory_space<vmem>>, %arg4: memref<10x208x128xf32, #tpu.memory_space<vmem>>, %arg5: memref<1x10xf32, #tpu.memory_space<vmem>>, %arg6: memref<1x1x10xf32, #tpu.memory_space<vmem>>) attributes {dimension_semantics = [#tpu.dimension_semantics<parallel>], iteration_bounds = array<i64: 2>, scalar_prefetch = 0 : i64, scratch_operands = 0 : i64, tpu.core_type = #tpu.core_type<tc>, window_params = [{transform_indices = @transform_0, window_bounds = array<i64: 4, 208, 49>}, {pipeline_mode = #tpu.pipeline_mode<synchronous>, transform_indices = @transform_1, window_bounds = array<i64: 49, 128>}, {pipeline_mode = #tpu.pipeline_mode<synchronous>, transform_indices = @transform_2, window_bounds = array<i64: 1, 128>}, {pipeline_mode = #tpu.pipeline_mode<synchronous>, transform_indices = @transform_3, window_bounds = array<i64: 10, 208, 128>}, {pipeline_mode = #tpu.pipeline_mode<synchronous>, transform_indices = @transform_4, window_bounds = array<i64: 1, 10>}, {transform_indices = @transform_5, window_bounds = array<i64: 1, 1, 10>}]} {
    %c0 = arith.constant 0 : index
    %c0_0 = arith.constant 0 : index
    %c0_1 = arith.constant 0 : index
    %0 = vector.load %arg1[%c0, %c0_0, %c0_1] : memref<4x208x49xbf16, #tpu.memory_space<vmem>>, vector<1x208x49xbf16>
    %1 = vector.shape_cast %0 : vector<1x208x49xbf16> to vector<208x49xbf16>
    %c0_2 = arith.constant 0 : index
    %c0_3 = arith.constant 0 : index
    %2 = vector.load %arg2[%c0_2, %c0_3] : memref<49x128xbf16, #tpu.memory_space<vmem>>, vector<49x128xbf16>
    %cst = arith.constant dense<0.000000e+00> : vector<208x128xf32>
    %3 = tpu.matmul %1, %2, %cst {dimension_numbers = #tpu.dot_dimension_numbers<[1], [0], [0], [1], [0, 0, 1, 1], [], []>} : vector<208x49xbf16>, vector<49x128xbf16>, vector<208x128xf32> -> vector<208x128xf32>
    %c1 = arith.constant 1 : index
    %c0_4 = arith.constant 0 : index
    %c0_5 = arith.constant 0 : index
    %4 = vector.load %arg1[%c1, %c0_4, %c0_5] : memref<4x208x49xbf16, #tpu.memory_space<vmem>>, vector<1x208x49xbf16>
    %5 = vector.shape_cast %4 : vector<1x208x49xbf16> to vector<208x49xbf16>
    %c0_6 = arith.constant 0 : index
    %c0_7 = arith.constant 0 : index
    %6 = vector.load %arg2[%c0_6, %c0_7] : memref<49x128xbf16, #tpu.memory_space<vmem>>, vector<49x128xbf16>
    %cst_8 = arith.constant dense<0.000000e+00> : vector<208x128xf32>
    %7 = tpu.matmul %5, %6, %cst_8 {dimension_numbers = #tpu.dot_dimension_numbers<[1], [0], [0], [1], [0, 0, 1, 1], [], []>} : vector<208x49xbf16>, vector<49x128xbf16>, vector<208x128xf32> -> vector<208x128xf32>
    %8 = arith.maximumf %3, %7 : vector<208x128xf32>
    %c2 = arith.constant 2 : index
    %c0_9 = arith.constant 0 : index
    %c0_10 = arith.constant 0 : index
    %9 = vector.load %arg1[%c2, %c0_9, %c0_10] : memref<4x208x49xbf16, #tpu.memory_space<vmem>>, vector<1x208x49xbf16>
    %10 = vector.shape_cast %9 : vector<1x208x49xbf16> to vector<208x49xbf16>
    %c0_11 = arith.constant 0 : index
    %c0_12 = arith.constant 0 : index
    %11 = vector.load %arg2[%c0_11, %c0_12] : memref<49x128xbf16, #tpu.memory_space<vmem>>, vector<49x128xbf16>
    %cst_13 = arith.constant dense<0.000000e+00> : vector<208x128xf32>
    %12 = tpu.matmul %10, %11, %cst_13 {dimension_numbers = #tpu.dot_dimension_numbers<[1], [0], [0], [1], [0, 0, 1, 1], [], []>} : vector<208x49xbf16>, vector<49x128xbf16>, vector<208x128xf32> -> vector<208x128xf32>
    %13 = arith.maximumf %8, %12 : vector<208x128xf32>
    %c3 = arith.constant 3 : index
    %c0_14 = arith.constant 0 : index
    %c0_15 = arith.constant 0 : index
    %14 = vector.load %arg1[%c3, %c0_14, %c0_15] : memref<4x208x49xbf16, #tpu.memory_space<vmem>>, vector<1x208x49xbf16>
    %15 = vector.shape_cast %14 : vector<1x208x49xbf16> to vector<208x49xbf16>
    %c0_16 = arith.constant 0 : index
    %c0_17 = arith.constant 0 : index
    %16 = vector.load %arg2[%c0_16, %c0_17] : memref<49x128xbf16, #tpu.memory_space<vmem>>, vector<49x128xbf16>
    %cst_18 = arith.constant dense<0.000000e+00> : vector<208x128xf32>
    %17 = tpu.matmul %15, %16, %cst_18 {dimension_numbers = #tpu.dot_dimension_numbers<[1], [0], [0], [1], [0, 0, 1, 1], [], []>} : vector<208x49xbf16>, vector<49x128xbf16>, vector<208x128xf32> -> vector<208x128xf32>
    %18 = arith.maximumf %13, %17 : vector<208x128xf32>
    %19 = vector.shape_cast %18 : vector<208x128xf32> to vector<1x208x128xf32>
    %c0_19 = arith.constant 0 : index
    %c0_20 = arith.constant 0 : index
    %20 = vector.load %arg3[%c0_19, %c0_20] : memref<1x128xf32, #tpu.memory_space<vmem>>, vector<1x128xf32>
    %21 = vector.shape_cast %20 : vector<1x128xf32> to vector<1x1x128xf32>
    %22 = vector.broadcast %21 : vector<1x1x128xf32> to vector<1x208x128xf32>
    %23 = arith.addf %19, %22 : vector<1x208x128xf32>
    %cst_21 = arith.constant 0.000000e+00 : f32
    %24 = vector.broadcast %cst_21 : f32 to vector<1x208x128xf32>
    %25 = arith.maximumf %23, %24 : vector<1x208x128xf32>
    %c0_22 = arith.constant 0 : index
    %c0_23 = arith.constant 0 : index
    %c0_24 = arith.constant 0 : index
    %26 = vector.load %arg4[%c0_22, %c0_23, %c0_24] : memref<10x208x128xf32, #tpu.memory_space<vmem>>, vector<1x208x128xf32>
    %27 = vector.shape_cast %26 : vector<1x208x128xf32> to vector<208x128xf32>
    %28 = vector.shape_cast %27 : vector<208x128xf32> to vector<1x208x128xf32>
    %29 = arith.mulf %25, %28 : vector<1x208x128xf32>
    %cst_25 = arith.constant dense<0.000000e+00> : vector<1x128xf32>
    %30 = vector.multi_reduction <add>, %29, %cst_25 [1] : vector<1x208x128xf32> to vector<1x128xf32>
    %31 = vector.shape_cast %30 : vector<1x128xf32> to vector<1x1x128xf32>
    %cst_26 = arith.constant dense<0.000000e+00> : vector<1x1xf32>
    %32 = vector.multi_reduction <add>, %31, %cst_26 [2] : vector<1x1x128xf32> to vector<1x1xf32>
    %33 = vector.shape_cast %32 : vector<1x1xf32> to vector<1x1x1xf32>
    %c1_27 = arith.constant 1 : index
    %c0_28 = arith.constant 0 : index
    %c0_29 = arith.constant 0 : index
    %34 = vector.load %arg4[%c1_27, %c0_28, %c0_29] : memref<10x208x128xf32, #tpu.memory_space<vmem>>, vector<1x208x128xf32>
    %35 = vector.shape_cast %34 : vector<1x208x128xf32> to vector<208x128xf32>
    %36 = vector.shape_cast %35 : vector<208x128xf32> to vector<1x208x128xf32>
    %37 = arith.mulf %25, %36 : vector<1x208x128xf32>
    %cst_30 = arith.constant dense<0.000000e+00> : vector<1x128xf32>
    %38 = vector.multi_reduction <add>, %37, %cst_30 [1] : vector<1x208x128xf32> to vector<1x128xf32>
    %39 = vector.shape_cast %38 : vector<1x128xf32> to vector<1x1x128xf32>
    %cst_31 = arith.constant dense<0.000000e+00> : vector<1x1xf32>
    %40 = vector.multi_reduction <add>, %39, %cst_31 [2] : vector<1x1x128xf32> to vector<1x1xf32>
    %41 = vector.shape_cast %40 : vector<1x1xf32> to vector<1x1x1xf32>
    %c2_32 = arith.constant 2 : index
    %c0_33 = arith.constant 0 : index
    %c0_34 = arith.constant 0 : index
    %42 = vector.load %arg4[%c2_32, %c0_33, %c0_34] : memref<10x208x128xf32, #tpu.memory_space<vmem>>, vector<1x208x128xf32>
    %43 = vector.shape_cast %42 : vector<1x208x128xf32> to vector<208x128xf32>
    %44 = vector.shape_cast %43 : vector<208x128xf32> to vector<1x208x128xf32>
    %45 = arith.mulf %25, %44 : vector<1x208x128xf32>
    %cst_35 = arith.constant dense<0.000000e+00> : vector<1x128xf32>
    %46 = vector.multi_reduction <add>, %45, %cst_35 [1] : vector<1x208x128xf32> to vector<1x128xf32>
    %47 = vector.shape_cast %46 : vector<1x128xf32> to vector<1x1x128xf32>
    %cst_36 = arith.constant dense<0.000000e+00> : vector<1x1xf32>
    %48 = vector.multi_reduction <add>, %47, %cst_36 [2] : vector<1x1x128xf32> to vector<1x1xf32>
    %49 = vector.shape_cast %48 : vector<1x1xf32> to vector<1x1x1xf32>
    %c3_37 = arith.constant 3 : index
    %c0_38 = arith.constant 0 : index
    %c0_39 = arith.constant 0 : index
    %50 = vector.load %arg4[%c3_37, %c0_38, %c0_39] : memref<10x208x128xf32, #tpu.memory_space<vmem>>, vector<1x208x128xf32>
    %51 = vector.shape_cast %50 : vector<1x208x128xf32> to vector<208x128xf32>
    %52 = vector.shape_cast %51 : vector<208x128xf32> to vector<1x208x128xf32>
    %53 = arith.mulf %25, %52 : vector<1x208x128xf32>
    %cst_40 = arith.constant dense<0.000000e+00> : vector<1x128xf32>
    %54 = vector.multi_reduction <add>, %53, %cst_40 [1] : vector<1x208x128xf32> to vector<1x128xf32>
    %55 = vector.shape_cast %54 : vector<1x128xf32> to vector<1x1x128xf32>
    %cst_41 = arith.constant dense<0.000000e+00> : vector<1x1xf32>
    %56 = vector.multi_reduction <add>, %55, %cst_41 [2] : vector<1x1x128xf32> to vector<1x1xf32>
    %57 = vector.shape_cast %56 : vector<1x1xf32> to vector<1x1x1xf32>
    %c4 = arith.constant 4 : index
    %c0_42 = arith.constant 0 : index
    %c0_43 = arith.constant 0 : index
    %58 = vector.load %arg4[%c4, %c0_42, %c0_43] : memref<10x208x128xf32, #tpu.memory_space<vmem>>, vector<1x208x128xf32>
    %59 = vector.shape_cast %58 : vector<1x208x128xf32> to vector<208x128xf32>
    %60 = vector.shape_cast %59 : vector<208x128xf32> to vector<1x208x128xf32>
    %61 = arith.mulf %25, %60 : vector<1x208x128xf32>
    %cst_44 = arith.constant dense<0.000000e+00> : vector<1x128xf32>
    %62 = vector.multi_reduction <add>, %61, %cst_44 [1] : vector<1x208x128xf32> to vector<1x128xf32>
    %63 = vector.shape_cast %62 : vector<1x128xf32> to vector<1x1x128xf32>
    %cst_45 = arith.constant dense<0.000000e+00> : vector<1x1xf32>
    %64 = vector.multi_reduction <add>, %63, %cst_45 [2] : vector<1x1x128xf32> to vector<1x1xf32>
    %65 = vector.shape_cast %64 : vector<1x1xf32> to vector<1x1x1xf32>
    %c5 = arith.constant 5 : index
    %c0_46 = arith.constant 0 : index
    %c0_47 = arith.constant 0 : index
    %66 = vector.load %arg4[%c5, %c0_46, %c0_47] : memref<10x208x128xf32, #tpu.memory_space<vmem>>, vector<1x208x128xf32>
    %67 = vector.shape_cast %66 : vector<1x208x128xf32> to vector<208x128xf32>
    %68 = vector.shape_cast %67 : vector<208x128xf32> to vector<1x208x128xf32>
    %69 = arith.mulf %25, %68 : vector<1x208x128xf32>
    %cst_48 = arith.constant dense<0.000000e+00> : vector<1x128xf32>
    %70 = vector.multi_reduction <add>, %69, %cst_48 [1] : vector<1x208x128xf32> to vector<1x128xf32>
    %71 = vector.shape_cast %70 : vector<1x128xf32> to vector<1x1x128xf32>
    %cst_49 = arith.constant dense<0.000000e+00> : vector<1x1xf32>
    %72 = vector.multi_reduction <add>, %71, %cst_49 [2] : vector<1x1x128xf32> to vector<1x1xf32>
    %73 = vector.shape_cast %72 : vector<1x1xf32> to vector<1x1x1xf32>
    %c6 = arith.constant 6 : index
    %c0_50 = arith.constant 0 : index
    %c0_51 = arith.constant 0 : index
    %74 = vector.load %arg4[%c6, %c0_50, %c0_51] : memref<10x208x128xf32, #tpu.memory_space<vmem>>, vector<1x208x128xf32>
    %75 = vector.shape_cast %74 : vector<1x208x128xf32> to vector<208x128xf32>
    %76 = vector.shape_cast %75 : vector<208x128xf32> to vector<1x208x128xf32>
    %77 = arith.mulf %25, %76 : vector<1x208x128xf32>
    %cst_52 = arith.constant dense<0.000000e+00> : vector<1x128xf32>
    %78 = vector.multi_reduction <add>, %77, %cst_52 [1] : vector<1x208x128xf32> to vector<1x128xf32>
    %79 = vector.shape_cast %78 : vector<1x128xf32> to vector<1x1x128xf32>
    %cst_53 = arith.constant dense<0.000000e+00> : vector<1x1xf32>
    %80 = vector.multi_reduction <add>, %79, %cst_53 [2] : vector<1x1x128xf32> to vector<1x1xf32>
    %81 = vector.shape_cast %80 : vector<1x1xf32> to vector<1x1x1xf32>
    %c7 = arith.constant 7 : index
    %c0_54 = arith.constant 0 : index
    %c0_55 = arith.constant 0 : index
    %82 = vector.load %arg4[%c7, %c0_54, %c0_55] : memref<10x208x128xf32, #tpu.memory_space<vmem>>, vector<1x208x128xf32>
    %83 = vector.shape_cast %82 : vector<1x208x128xf32> to vector<208x128xf32>
    %84 = vector.shape_cast %83 : vector<208x128xf32> to vector<1x208x128xf32>
    %85 = arith.mulf %25, %84 : vector<1x208x128xf32>
    %cst_56 = arith.constant dense<0.000000e+00> : vector<1x128xf32>
    %86 = vector.multi_reduction <add>, %85, %cst_56 [1] : vector<1x208x128xf32> to vector<1x128xf32>
    %87 = vector.shape_cast %86 : vector<1x128xf32> to vector<1x1x128xf32>
    %cst_57 = arith.constant dense<0.000000e+00> : vector<1x1xf32>
    %88 = vector.multi_reduction <add>, %87, %cst_57 [2] : vector<1x1x128xf32> to vector<1x1xf32>
    %89 = vector.shape_cast %88 : vector<1x1xf32> to vector<1x1x1xf32>
    %c8 = arith.constant 8 : index
    %c0_58 = arith.constant 0 : index
    %c0_59 = arith.constant 0 : index
    %90 = vector.load %arg4[%c8, %c0_58, %c0_59] : memref<10x208x128xf32, #tpu.memory_space<vmem>>, vector<1x208x128xf32>
    %91 = vector.shape_cast %90 : vector<1x208x128xf32> to vector<208x128xf32>
    %92 = vector.shape_cast %91 : vector<208x128xf32> to vector<1x208x128xf32>
    %93 = arith.mulf %25, %92 : vector<1x208x128xf32>
    %cst_60 = arith.constant dense<0.000000e+00> : vector<1x128xf32>
    %94 = vector.multi_reduction <add>, %93, %cst_60 [1] : vector<1x208x128xf32> to vector<1x128xf32>
    %95 = vector.shape_cast %94 : vector<1x128xf32> to vector<1x1x128xf32>
    %cst_61 = arith.constant dense<0.000000e+00> : vector<1x1xf32>
    %96 = vector.multi_reduction <add>, %95, %cst_61 [2] : vector<1x1x128xf32> to vector<1x1xf32>
    %97 = vector.shape_cast %96 : vector<1x1xf32> to vector<1x1x1xf32>
    %c9 = arith.constant 9 : index
    %c0_62 = arith.constant 0 : index
    %c0_63 = arith.constant 0 : index
    %98 = vector.load %arg4[%c9, %c0_62, %c0_63] : memref<10x208x128xf32, #tpu.memory_space<vmem>>, vector<1x208x128xf32>
    %99 = vector.shape_cast %98 : vector<1x208x128xf32> to vector<208x128xf32>
    %100 = vector.shape_cast %99 : vector<208x128xf32> to vector<1x208x128xf32>
    %101 = arith.mulf %25, %100 : vector<1x208x128xf32>
    %cst_64 = arith.constant dense<0.000000e+00> : vector<1x128xf32>
    %102 = vector.multi_reduction <add>, %101, %cst_64 [1] : vector<1x208x128xf32> to vector<1x128xf32>
    %103 = vector.shape_cast %102 : vector<1x128xf32> to vector<1x1x128xf32>
    %cst_65 = arith.constant dense<0.000000e+00> : vector<1x1xf32>
    %104 = vector.multi_reduction <add>, %103, %cst_65 [2] : vector<1x1x128xf32> to vector<1x1xf32>
    %105 = vector.shape_cast %104 : vector<1x1xf32> to vector<1x1x1xf32>
    %106 = tpu.concatenate %33, %41, %49, %57, %65, %73, %81, %89, %97, %105 in 2 : vector<1x1x1xf32>, vector<1x1x1xf32>, vector<1x1x1xf32>, vector<1x1x1xf32>, vector<1x1x1xf32>, vector<1x1x1xf32>, vector<1x1x1xf32>, vector<1x1x1xf32>, vector<1x1x1xf32>, vector<1x1x1xf32> -> vector<1x1x10xf32>
    %c0_66 = arith.constant 0 : index
    %c0_67 = arith.constant 0 : index
    %107 = vector.load %arg5[%c0_66, %c0_67] : memref<1x10xf32, #tpu.memory_space<vmem>>, vector<1x10xf32>
    %108 = vector.shape_cast %107 : vector<1x10xf32> to vector<1x1x10xf32>
    %109 = arith.addf %106, %108 : vector<1x1x10xf32>
    %c0_68 = arith.constant 0 : index
    %c0_69 = arith.constant 0 : index
    %c0_70 = arith.constant 0 : index
    %110 = vector.load %arg6[%c0_68, %c0_69, %c0_70] : memref<1x1x10xf32, #tpu.memory_space<vmem>>, vector<1x1x10xf32>
    tpu.vector_store %arg6[%c0_68, %c0_69, %c0_70], %109 {strides = array<i32>} : memref<1x1x10xf32, #tpu.memory_space<vmem>>, vector<1x1x10xf32>,
    return
  }
  func.func @transform_0(%arg0: i32) -> (i32, i32, i32) {
    %c0_i32 = arith.constant 0 : i32
    %c0_i32_0 = arith.constant 0 : i32
    %c0_i32_1 = arith.constant 0 : i32
    return %c0_i32, %arg0, %c0_i32_0 : i32, i32, i32
  }
  func.func @transform_1(%arg0: i32) -> (i32, i32) {
    %c0_i32 = arith.constant 0 : i32
    %c0_i32_0 = arith.constant 0 : i32
    %c0_i32_1 = arith.constant 0 : i32
    return %c0_i32, %c0_i32_0 : i32, i32
  }
  func.func @transform_2(%arg0: i32) -> (i32, i32) {
    %c0_i32 = arith.constant 0 : i32
    %c0_i32_0 = arith.constant 0 : i32
    %c0_i32_1 = arith.constant 0 : i32
    return %c0_i32, %c0_i32_0 : i32, i32
  }
  func.func @transform_3(%arg0: i32) -> (i32, i32, i32) {
    %c0_i32 = arith.constant 0 : i32
    %c0_i32_0 = arith.constant 0 : i32
    %c0_i32_1 = arith.constant 0 : i32
    %c0_i32_2 = arith.constant 0 : i32
    return %c0_i32, %c0_i32_0, %c0_i32_1 : i32, i32, i32
  }
  func.func @transform_4(%arg0: i32) -> (i32, i32) {
    %c0_i32 = arith.constant 0 : i32
    %c0_i32_0 = arith.constant 0 : i32
    %c0_i32_1 = arith.constant 0 : i32
    return %c0_i32, %c0_i32_0 : i32, i32
  }
  func.func @transform_5(%arg0: i32) -> (i32, i32, i32) {
    %c0_i32 = arith.constant 0 : i32
    %c0_i32_0 = arith.constant 0 : i32
    %c0_i32_1 = arith.constant 0 : i32
    return %arg0, %c0_i32, %c0_i32_0 : i32, i32, i32
  }
}

</mosaic_0001>

<bundles_post_ra>
// kernel: tpu_custom_call.1
= control target key start
LH: loop header
LB: loop body
LE: loop exit
PB: predicated region body
PF: predicated region fallthrough
CT: control target
= control target key end

     0   :  { %10 = vsyncpa [#allocation4], 0  ;;  %s5032_s0 = inlined_call_operand.vmem [shape: bf16[4,416,49], index: 0, kind: input, shape index: {}]   ;;  %s5033_s1 = inlined_call_operand.hbm [shape: bf16[49,128], index: 1, kind: input, shape index: {}]   ;;  %s5034_s2 = inlined_call_operand.hbm [shape: f32[1,128], index: 2, kind: input, shape index: {}]   ;;  %s5035_s3 = inlined_call_operand.hbm [shape: f32[10,208,128], index: 3, kind: input, shape index: {}]   ;;  %s5036_s4 = inlined_call_operand.hbm [shape: f32[1,10], index: 4, kind: input, shape index: {}]   ;;  %s5037_s5 = inlined_call_operand.hbm [shape: f32[2,1,10], index: 5, kind: output, shape index: {}]  }
   0x1   :  { %11 = vsyncpa [#allocation7], 0 }
   0x2   :  { %12 = vsyncpa [#allocation10], 0 }
   0x3   :  { %13 = vsyncpa [#allocation5], 0 }
   0x4   :  { %15 = vsyncpa [#allocation5 + $0x1], 0  ;;  %s3852_s18 = smov 0   ;;  %s3854_s19 = smov 0  }
   0x5   :  { %s3856_s20 = smov 0   ;;  %s3858_s21 = smov 0  }
   0x6 LB: > { %s3873_s22 = sadd.s32 4294967295, %s3808_s21   ;;  %s2974_s23 = sadd.s32 4294967294, %s3808_s21   ;;  %s3808_s21 = sphi %s3858_s21, %s5162_s21   ;;  %s3804_s20 = sphi %s3856_s20, %s5161_s20   ;;  %s3800_s19 = sphi %s3854_s19, %s5160_s19   ;;  %s3796_s18 = sphi %s3852_s18, %s5159_s18  }
   0x7   : > { %s3877_s24 = sadd.s32 1, %s3808_s21   ;;  %s28_s25 = sadd.s32 1, %s3804_s20 }
   0x8   : > { %s25_s26 = ssub.s32 %s3808_s21, %s3877_s24  ;;  %p35_p0 = scmp.ne.s32.totalorder %s3804_s20, %s3800_s19 }
   0x9   : > { %p26_p1 = scmp.eq.s32.totalorder %s25_s26, 0  ;;  %p36_p2 = scmp.eq.s32.totalorder %s3808_s21, 0 }
   0xa   : > { %p149_p3 = scmp.eq.s32.totalorder %s3873_s22, 1  ;;  %p154_p4 = scmp.ne.s32.totalorder %s3800_s19, %s3796_s18 }
   0xb   : > { %s3889_s27 = scalar_select %p26_p1, %s3804_s20, %s28_s25  }
   0xc   : > { %p3891_p5 = por %p36_p2, %p35_p0  ;;  %p3895_p6 = por %p149_p3, %p35_p0 }
   0xd   : > { %p155_p7 = scmp.eq.s32.totalorder %s2974_s23, 1  ;;  %p2975_p8 = scmp.ge.s32.totalorder %s3808_s21, 1 }
   0xe   : > { %p162_p9 = scmp.lt.s32.totalorder %s3808_s21, 3  ;;  %p5038_p11 = scmp.eq.s32.totalorder %s3873_s22, 0 }
   0xf   : > { %p3901_p10 = por %p155_p7, %p154_p4  ;;  %s3810_s7 = smov [#allocation6]  }
  0x10   : > { %p3906_p12 = pnand %p2975_p8, %p162_p9  ;;  %s188_s8 = sshll.u32 %s3810_s7, 4  ;;  %s189_s8 = int_to_ptr.vmem [resolvable:$true] %s188_s8 }
  0x11   : > { %s3811_s9 = smov [#allocation3]   ;;  %s3812_s12 = smov [#allocation8]  }
  0x12   : > { %p3506_p13 = pneg %p3906_p12  ;;  %s174_s10 = sshll.u32 %s3811_s9, 4  ;;  %s3918_s10 = int_to_ptr.vmem [resolvable:$true] %s174_s10 }
  0x13   : > { %s198_s13 = sshll.u32 %s3812_s12, 4  ;;  %s3643_s14 = scalar_lea.vmem %s189_s8, 16  ;;  %s199_s13 = int_to_ptr.vmem [resolvable:$true] %s198_s13 }
  0x14   : > { %p3914_p0 = pnand %p5038_p11, %p3506_p13  ;;  %p3644_p2 = scmp.ne.s32.totalorder %s189_s8, %s3643_s14 }
  0x15   : > { %s3650_s15 = scalar_lea.vmem %s189_s8, 32  ;;  %p3651_p7 = scmp.lt.s32.totalorder %s189_s8, %s189_s8 }
  0x16   : > { %p3634_p1 = pneg %p3914_p0  ;;  %p3652_p8 = scmp.lt.s32.totalorder %s3650_s15, %s3643_s14 }
  0x18   : > { %p3646_p3 = pnand %p3644_p2, %p3634_p1  ;;  %p3653_p9 = por %p3652_p8, %p3651_p7 }
  0x1a   : > { %p3647_p4 = pneg %p3646_p3 }
  0x1c   : > { %p3654_p13 = pnand %p3653_p9, %p3647_p4 }
  0x1e   : > { %3657 = shalt.err (!%p3654_p13)
}
  0x1f   : > { %3512 = dma.hbm_to_vmem [thread:$0]  (!%p3914_p0), %s5034_s2, 16, %s189_s8, [#allocation7]  }
  0x20   : > { %s3669_s23 = scalar_lea.vmem %s3918_s10, 448  ;;  %p3677_p7 = scmp.lt.s32.totalorder %s3918_s10, %s3918_s10 }
  0x21   : > { %p3670_p11 = scmp.ne.s32.totalorder %s3918_s10, %s3669_s23  ;;  %p3678_p4 = scmp.lt.s32.totalorder %s3669_s23, %s3669_s23 }
  0x23   : > { %p3672_p2 = pnand %p3670_p11, %p3634_p1  ;;  %p3679_p8 = por %p3678_p4, %p3677_p7 }
  0x25   : > { %p3673_p3 = pneg %p3672_p2 }
  0x27   : > { %p3680_p9 = pnand %p3679_p8, %p3673_p3 }
  0x29   : > { %3683 = shalt.err (!%p3680_p9)
}
  0x2a   : > { %s3813_s25 = smov 64   ;;  %s3814_s26 = smov 4  }
  0x2b   : > { %3509 = dma.hbm_to_vmem [thread:$0]  (!%p3914_p0), %s5033_s1, 448, %s3918_s10, [#allocation4], %s3813_s25, %s3813_s25, %s3814_s26  }
  0x2c   : > { %s3695_s9 = scalar_lea.vmem %s199_s13, 33280  ;;  %p3703_p7 = scmp.lt.s32.totalorder %s199_s13, %s199_s13 }
  0x2d   : > { %p3696_p11 = scmp.ne.s32.totalorder %s199_s13, %s3695_s9  ;;  %p3704_p3 = scmp.lt.s32.totalorder %s3695_s9, %s3695_s9 }
  0x2f   : > { %p3698_p13 = pnand %p3696_p11, %p3634_p1  ;;  %p3705_p4 = por %p3704_p3, %p3703_p7 }
  0x31   : > { %p3699_p2 = pneg %p3698_p13 }
  0x33   : > { %p3706_p8 = pnand %p3705_p4, %p3699_p2 }
  0x35   : > { %3709 = shalt.err (!%p3706_p8)
}
  0x36   : > { %s3815_s12 = smov 128   ;;  %s3816_s14 = smov 8  }
  0x37   : > { %3515 = dma.hbm_to_vmem [thread:$0]  (!%p3914_p0), %s5035_s3, 33280, %s199_s13, [#allocation7], %s3815_s12, %s3815_s12, %s3816_s14  }
  0x38   : > { %s3817_s10 = smov [#allocation9]  }
  0x39   : > { %s212_s17 = sshll.u32 %s3817_s10, 4  ;;  %s213_s17 = int_to_ptr.vmem [resolvable:$true] %s212_s17 }
  0x3a   : > { %s3721_s23 = scalar_lea.vmem %s213_s17, 16  ;;  %s3728_s25 = scalar_lea.vmem %s213_s17, 32 }
  0x3b   : > { %p3722_p9 = scmp.ne.s32.totalorder %s213_s17, %s3721_s23  ;;  %p3729_p2 = scmp.lt.s32.totalorder %s213_s17, %s213_s17 }
  0x3c   : > { %p3730_p7 = scmp.lt.s32.totalorder %s3728_s25, %s3721_s23 }
  0x3d   : > { %p3724_p11 = pnand %p3722_p9, %p3634_p1 }
  0x3e   : > { %p3731_p3 = por %p3730_p7, %p3729_p2 }
  0x3f   : > { %p3725_p13 = pneg %p3724_p11 }
  0x41   : > { %p3732_p4 = pnand %p3731_p3, %p3725_p13 }
  0x43   : > { %3735 = shalt.err (!%p3732_p4)
}
  0x44   : > { %3518 = dma.hbm_to_vmem [thread:$0]  (!%p3914_p0), %s5036_s4, 16, %s213_s17, [#allocation10]  }
  0x45   : > { %p5065_p8 = scmp.ge.s32.totalorder %s3808_s21, 2 }
  0x47   : > { %219 = sbr.rel (%p5065_p8) target bundleno = 107 (0x6b), region = 32 }
  0x4c   : > { %222 = sbr.rel (!%p3891_p5) target bundleno = 107 (0x6b), region = 36  ;;  %s224_s13 = sand.u32 (%p3891_p5), 1, %s3804_s20  }
  0x4d   : > { %s3177_s8 = smul.u32 (%p3891_p5), 104, %s3808_s21 }
  0x4e   : > { %s3486_s9 = smul.u32 (%p3891_p5), 416, %s224_s13 }
  0x4f   : > { %s3969_s11 = scalar_lea.vmem (%p3891_p5), %s5032_s0, %s3177_s8 }
  0x50   : > { %v246_v0 = vld [vmem:[%s3969_s11] sm:$0xff] (%p3891_p5)   ;;  %v250_v1 = vld [vmem:[%s3969_s11 + $0x8] sm:$0xff] (%p3891_p5)   ;;  %v254_v2 = vld [vmem:[%s3969_s11 + $0x10] sm:$0xff] (%p3891_p5)   ;;  %s3974_s28 = scalar_lea.vmem (%p3891_p5), [#allocation2], %s3486_s9 }
  0x51   : > { %247 = vst [vmem:[%s3974_s28] sm:$0xff] %v246_v0   ;;  %251 = vst [vmem:[%s3974_s28 + $0x8] sm:$0xff] %v250_v1   ;;  %v258_v3 = vld [vmem:[%s3969_s11 + $0x18] sm:$0xff]   ;;  %v262_v4 = vld [vmem:[%s3969_s11 + $0x20] sm:$0xff]  }
  0x52   : > { %255 = vst [vmem:[%s3974_s28 + $0x10] sm:$0xff] %v254_v2   ;;  %v266_v5 = vld [vmem:[%s3969_s11 + $0x28] sm:$0xff]   ;;  %259 = vst [vmem:[%s3974_s28 + $0x18] sm:$0xff] %v258_v3   ;;  %v270_v6 = vld [vmem:[%s3969_s11 + $0x30] sm:$0xff]  }
  0x53   : > { %263 = vst [vmem:[%s3974_s28 + $0x20] sm:$0xff] %v262_v4   ;;  %267 = vst [vmem:[%s3974_s28 + $0x28] sm:$0xff] %v266_v5   ;;  %v274_v7 = vld [vmem:[%s3969_s11 + $0x38] sm:$0xff]   ;;  %v278_v8 = vld [vmem:[%s3969_s11 + $0x40] sm:$0xff]  }
  0x54   : > { %271 = vst [vmem:[%s3974_s28 + $0x30] sm:$0xff] %v270_v6   ;;  %275 = vst [vmem:[%s3974_s28 + $0x38] sm:$0xff] %v274_v7   ;;  %v282_v9 = vld [vmem:[%s3969_s11 + $0x48] sm:$0xff]   ;;  %v286_v10 = vld [vmem:[%s3969_s11 + $0x50] sm:$0xff]  }
  0x55   : > { %279 = vst [vmem:[%s3974_s28 + $0x40] sm:$0xff] %v278_v8   ;;  %v290_v11 = vld [vmem:[%s3969_s11 + $0x58] sm:$0xff]   ;;  %283 = vst [vmem:[%s3974_s28 + $0x48] sm:$0xff] %v282_v9   ;;  %v294_v12 = vld [vmem:[%s3969_s11 + $0x60] sm:$0xff]  }
  0x56   : > { %287 = vst [vmem:[%s3974_s28 + $0x50] sm:$0xff] %v286_v10   ;;  %291 = vst [vmem:[%s3974_s28 + $0x58] sm:$0xff] %v290_v11   ;;  %v298_v13 = vld [vmem:[%s3969_s11 + $0xd0] sm:$0xff]   ;;  %v302_v14 = vld [vmem:[%s3969_s11 + $0xd8] sm:$0xff]  }
  0x57   : > { %295 = vst [vmem:[%s3974_s28 + $0x60] sm:$0xff] %v294_v12   ;;  %299 = vst [vmem:[%s3974_s28 + $0x68] sm:$0xff] %v298_v13   ;;  %v306_v15 = vld [vmem:[%s3969_s11 + $0xe0] sm:$0xff]   ;;  %v310_v16 = vld [vmem:[%s3969_s11 + $0xe8] sm:$0xff]  }
  0x58   : > { %303 = vst [vmem:[%s3974_s28 + $0x70] sm:$0xff] %v302_v14   ;;  %v314_v17 = vld [vmem:[%s3969_s11 + $0xf0] sm:$0xff]   ;;  %307 = vst [vmem:[%s3974_s28 + $0x78] sm:$0xff] %v306_v15   ;;  %v318_v18 = vld [vmem:[%s3969_s11 + $0xf8] sm:$0xff]  }
  0x59   : > { %311 = vst [vmem:[%s3974_s28 + $0x80] sm:$0xff] %v310_v16   ;;  %315 = vst [vmem:[%s3974_s28 + $0x88] sm:$0xff] %v314_v17   ;;  %v322_v19 = vld [vmem:[%s3969_s11 + $0x100] sm:$0xff]   ;;  %v326_v20 = vld [vmem:[%s3969_s11 + $0x108] sm:$0xff]  }
  0x5a   : > { %319 = vst [vmem:[%s3974_s28 + $0x90] sm:$0xff] %v318_v18   ;;  %323 = vst [vmem:[%s3974_s28 + $0x98] sm:$0xff] %v322_v19   ;;  %v330_v21 = vld [vmem:[%s3969_s11 + $0x110] sm:$0xff]   ;;  %v334_v22 = vld [vmem:[%s3969_s11 + $0x118] sm:$0xff]  }
  0x5b   : > { %327 = vst [vmem:[%s3974_s28 + $0xa0] sm:$0xff] %v326_v20   ;;  %v338_v23 = vld [vmem:[%s3969_s11 + $0x120] sm:$0xff]   ;;  %331 = vst [vmem:[%s3974_s28 + $0xa8] sm:$0xff] %v330_v21   ;;  %v342_v24 = vld [vmem:[%s3969_s11 + $0x128] sm:$0xff]  }
  0x5c   : > { %335 = vst [vmem:[%s3974_s28 + $0xb0] sm:$0xff] %v334_v22   ;;  %339 = vst [vmem:[%s3974_s28 + $0xb8] sm:$0xff] %v338_v23   ;;  %v346_v25 = vld [vmem:[%s3969_s11 + $0x130] sm:$0xff]   ;;  %v350_v26 = vld [vmem:[%s3969_s11 + $0x1a0] sm:$0xff]  }
  0x5d   : > { %343 = vst [vmem:[%s3974_s28 + $0xc0] sm:$0xff] %v342_v24   ;;  %347 = vst [vmem:[%s3974_s28 + $0xc8] sm:$0xff] %v346_v25   ;;  %v354_v27 = vld [vmem:[%s3969_s11 + $0x1a8] sm:$0xff]   ;;  %v358_v28 = vld [vmem:[%s3969_s11 + $0x1b0] sm:$0xff]  }
  0x5e   : > { %351 = vst [vmem:[%s3974_s28 + $0xd0] sm:$0xff] %v350_v26   ;;  %v362_v29 = vld [vmem:[%s3969_s11 + $0x1b8] sm:$0xff]   ;;  %355 = vst [vmem:[%s3974_s28 + $0xd8] sm:$0xff] %v354_v27   ;;  %v366_v30 = vld [vmem:[%s3969_s11 + $0x1c0] sm:$0xff]  }
  0x5f   : > { %359 = vst [vmem:[%s3974_s28 + $0xe0] sm:$0xff] %v358_v28   ;;  %363 = vst [vmem:[%s3974_s28 + $0xe8] sm:$0xff] %v362_v29   ;;  %v370_v31 = vld [vmem:[%s3969_s11 + $0x1c8] sm:$0xff]   ;;  %v374_v32 = vld [vmem:[%s3969_s11 + $0x1d0] sm:$0xff]  }
  0x60   : > { %367 = vst [vmem:[%s3974_s28 + $0xf0] sm:$0xff] %v366_v30   ;;  %371 = vst [vmem:[%s3974_s28 + $0xf8] sm:$0xff] %v370_v31   ;;  %v378_v33 = vld [vmem:[%s3969_s11 + $0x1d8] sm:$0xff]   ;;  %v382_v34 = vld [vmem:[%s3969_s11 + $0x1e0] sm:$0xff]  }
  0x61   : > { %375 = vst [vmem:[%s3974_s28 + $0x100] sm:$0xff] %v374_v32   ;;  %v386_v35 = vld [vmem:[%s3969_s11 + $0x1e8] sm:$0xff]   ;;  %379 = vst [vmem:[%s3974_s28 + $0x108] sm:$0xff] %v378_v33   ;;  %v390_v36 = vld [vmem:[%s3969_s11 + $0x1f0] sm:$0xff]  }
  0x62   : > { %383 = vst [vmem:[%s3974_s28 + $0x110] sm:$0xff] %v382_v34   ;;  %387 = vst [vmem:[%s3974_s28 + $0x118] sm:$0xff] %v386_v35   ;;  %v394_v37 = vld [vmem:[%s3969_s11 + $0x1f8] sm:$0xff]   ;;  %v398_v38 = vld [vmem:[%s3969_s11 + $0x200] sm:$0xff]  }
  0x63   : > { %391 = vst [vmem:[%s3974_s28 + $0x120] sm:$0xff] %v390_v36   ;;  %395 = vst [vmem:[%s3974_s28 + $0x128] sm:$0xff] %v394_v37   ;;  %v402_v39 = vld [vmem:[%s3969_s11 + $0x270] sm:$0xff]   ;;  %v406_v40 = vld [vmem:[%s3969_s11 + $0x278] sm:$0xff]  }
  0x64   : > { %399 = vst [vmem:[%s3974_s28 + $0x130] sm:$0xff] %v398_v38   ;;  %v410_v41 = vld [vmem:[%s3969_s11 + $0x280] sm:$0xff]   ;;  %403 = vst [vmem:[%s3974_s28 + $0x138] sm:$0xff] %v402_v39   ;;  %v414_v42 = vld [vmem:[%s3969_s11 + $0x288] sm:$0xff]  }
  0x65   : > { %407 = vst [vmem:[%s3974_s28 + $0x140] sm:$0xff] %v406_v40   ;;  %411 = vst [vmem:[%s3974_s28 + $0x148] sm:$0xff] %v410_v41   ;;  %v418_v43 = vld [vmem:[%s3969_s11 + $0x290] sm:$0xff]   ;;  %v422_v44 = vld [vmem:[%s3969_s11 + $0x298] sm:$0xff]  }
  0x66   : > { %415 = vst [vmem:[%s3974_s28 + $0x150] sm:$0xff] %v414_v42   ;;  %419 = vst [vmem:[%s3974_s28 + $0x158] sm:$0xff] %v418_v43   ;;  %v426_v45 = vld [vmem:[%s3969_s11 + $0x2a0] sm:$0xff]   ;;  %v430_v46 = vld [vmem:[%s3969_s11 + $0x2a8] sm:$0xff]  }
  0x67   : > { %423 = vst [vmem:[%s3974_s28 + $0x160] sm:$0xff] %v422_v44   ;;  %v434_v47 = vld [vmem:[%s3969_s11 + $0x2b0] sm:$0xff]   ;;  %427 = vst [vmem:[%s3974_s28 + $0x168] sm:$0xff] %v426_v45   ;;  %v438_v48 = vld [vmem:[%s3969_s11 + $0x2b8] sm:$0xff]  }
  0x68   : > { %431 = vst [vmem:[%s3974_s28 + $0x170] sm:$0xff] %v430_v46   ;;  %435 = vst [vmem:[%s3974_s28 + $0x178] sm:$0xff] %v434_v47   ;;  %v442_v49 = vld [vmem:[%s3969_s11 + $0x2c0] sm:$0xff]   ;;  %v446_v50 = vld [vmem:[%s3969_s11 + $0x2c8] sm:$0xff]  }
  0x69   : > { %439 = vst [vmem:[%s3974_s28 + $0x180] sm:$0xff] %v438_v48   ;;  %443 = vst [vmem:[%s3974_s28 + $0x188] sm:$0xff] %v442_v49   ;;  %v450_v51 = vld [vmem:[%s3969_s11 + $0x2d0] sm:$0xff]  }
  0x6a   : > { %447 = vst [vmem:[%s3974_s28 + $0x190] sm:$0xff] %v446_v50   ;;  %451 = vst [vmem:[%s3974_s28 + $0x198] sm:$0xff] %v450_v51  }
  0x6b PF: > { %688 = sbr.rel (%p3906_p12) target bundleno = 807 (0x327), region = 77 }
  0x70   : > { %s4080_s15 = sand.u32 1, %s3800_s19   ;;  %p5071_p5 = scmp.eq.s32.totalorder %s3873_s22, 0 }
  0x71   : > { %s3487_s16 = smul.u32 416, %s4080_s15 }
  0x73   : > { %s4083_s10 = scalar_lea.vmem [#allocation2], %s3487_s16 }
  0x74   : > { %3779 = dma.done.wait (%p5071_p5), [#allocation4], 448   ;;  %p5072_p0 = pmov %p5071_p5 }
  0x76   : > { %3781 = vsyncadd (%p5072_p0), [#allocation4], 4294966848  ;;  %p5073_p1 = pmov %p5072_p0 }
  0x77   : > { %p5074_p9 = pmov %p5072_p0 }
  0x78   : > { %3783 = dma.done.wait (%p5073_p1), [#allocation7], 33296  }
  0x79   : > { %3785 = vsyncadd (%p5074_p9), [#allocation7], 4294934000  ;;  %p5075_p12 = pmov %p5072_p0 }
  0x7a   : > { %p5076_p11 = pmov %p5072_p0 }
  0x7b   : > { %3787 = dma.done.wait (%p5075_p12), [#allocation10], 16  }
  0x7c   : > { %3789 = vsyncadd (%p5076_p11), [#allocation10], 4294967280  ;;  %v3818_v52 = vmov 0.0   ;;  %vm3819_vm0 = vmmov 0   ;;  %vm894_vm1 = vcmask 1040384   ;;  %v3820_v53 = vmov 0  }
  0x7d   : > { %3246 = vmatprep.subr.bf16.mxu0 %v3818_v52  ;;  %3306 = vmatprep.subr.bf16.mxu1 %v3818_v52  ;;  %v896_v54 = vsel %vm894_vm1, 65535, %v3820_v53  ;;  %v3575_v55 = vld [vmem:[#allocation3 + $0x18] ss:$0 sps:$4 sm:$0x11]   ;;  %v3576_v57 = vld [vmem:[#allocation3 + $0x10] sm:$0xff]   ;;  %v3577_v58 = vld [vmem:[#allocation3 + $0x8] sm:$0xff]  }
  0x7e   : > { %3254 = vmatprep.mubr.msk.bf16.mxu0 %vm3819_vm0, %v3818_v52  ;;  %3314 = vmatprep.mubr.msk.bf16.mxu1 %vm3819_vm0, %v3818_v52  ;;  %v898_v56 = vand.u32 %v3575_v55, %v896_v54  ;;  %v3578_v59 = vld [vmem:[#allocation3] sm:$0xff]   ;;  %v3580_v61 = vld [vmem:[%s4083_s10 + $0x68] sm:$0xff]   ;;  %vm854_vm2 = vcmask 400384   ;;  %v3582_v63 = vld [vmem:[%s4083_s10 + $0x70] sm:$0xff]   ;;  %vm2837_vm3 = vcmask 7168   ;;  %vm2839_vm4 = vcmask 15360  }
  0x7f   : > { %v3579_v60 = vld [vmem:[%s4083_s10] sm:$0xff]   ;;  %v3581_v62 = vld [vmem:[%s4083_s10 + $0x8] sm:$0xff]   ;;  %v3583_v0 = vld [vmem:[%s4083_s10 + $0x10] sm:$0xff]   ;;  %vm2841_vm5 = vcmask 23552   ;;  %vm2843_vm6 = vcmask 31744   ;;  %vm2845_vm7 = vcmask 39936  }
  0x80   : > { %3247 = vmatpush3.bf16.msra.mxu0 %v898_v56  ;;  %3307 = vmatpush3.bf16.msra.mxu1 %v898_v56  ;;  %v3584_v1 = vld [vmem:[%s4083_s10 + $0x78] sm:$0xff]   ;;  %v3586_v3 = vld [vmem:[%s4083_s10 + $0x80] sm:$0xff]   ;;  %v3588_v5 = vld [vmem:[%s4083_s10 + $0x88] sm:$0xff]   ;;  %vm2847_vm8 = vcmask 48128   ;;  %vm2849_vm9 = vcmask 56320   ;;  %vm2851_vm10 = vcmask 64512  }
  0x81   : > { %3248 = vmatprep.subr.bf16.mxu0 %v3818_v52  ;;  %3308 = vmatprep.subr.bf16.mxu1 %v3818_v52  ;;  %v3585_v2 = vld [vmem:[%s4083_s10 + $0x18] sm:$0xff]   ;;  %v3587_v4 = vld [vmem:[%s4083_s10 + $0x20] sm:$0xff]   ;;  %v3589_v6 = vld [vmem:[%s4083_s10 + $0x28] sm:$0xff]   ;;  %vm2853_vm11 = vcmask 72704   ;;  %s3174_s6 = sshll.u32 %s3873_s22, 4  ;;  %s732_s17 = scalar_lea.vmem [#allocation11], %s4080_s15 }
  0x82   : > { %v3590_v7 = vld [vmem:[%s4083_s10 + $0x90] sm:$0xff]   ;;  %v3592_v9 = vld [vmem:[%s4083_s10 + $0x98] sm:$0xff]   ;;  %v3594_v11 = vld [vmem:[%s4083_s10 + $0xa0] sm:$0xff]   ;;  %s2872_s23 = sshll.u32 %s732_s17, 4  ;;  %vm2857_vm12 = vcmask 73728   ;;  %s2870_s7 = scalar_lea.hbm %s5037_s5, %s3174_s6  ;;  %s2873_s23 = int_to_ptr.vmem [resolvable:$true] %s2872_s23 }
  0x83   : > { %v3591_v8 = vld [vmem:[%s4083_s10 + $0x30] sm:$0xff]   ;;  %v3593_v10 = vld [vmem:[%s4083_s10 + $0x38] sm:$0xff]   ;;  %v3595_v12 = vld [vmem:[%s4083_s10 + $0x40] sm:$0xff]   ;;  %s2860_s13 = scalar_lea.sflag [#allocation5], %s4080_s15  ;;  %s3736_s8 = scalar_lea.vmem %s2873_s23, 16 }
  0x84   : > { %3249 = vmatpush3.bf16.msra.mxu0 %v3576_v57  ;;  %3309 = vmatpush3.bf16.msra.mxu1 %v3576_v57  ;;  %v3596_v13 = vld [vmem:[%s4083_s10 + $0xa8] sm:$0xff]   ;;  %v3598_v15 = vld [vmem:[%s4083_s10 + $0xb0] sm:$0xff]   ;;  %v3600_v17 = vld [vmem:[%s4083_s10 + $0xb8] sm:$0xff]   ;;  %p3737_p13 = scmp.ne.s32.totalorder %s2873_s23, %s3736_s8  ;;  %s3821_s9 = smov [#allocation11]  }
  0x85   : > { %3250 = vmatprep.subr.bf16.mxu0 %v3818_v52  ;;  %3310 = vmatprep.subr.bf16.mxu1 %v3818_v52  ;;  %v3597_v14 = vld [vmem:[%s4083_s10 + $0x48] sm:$0xff]   ;;  %v3599_v16 = vld [vmem:[%s4083_s10 + $0x50] sm:$0xff]   ;;  %v3601_v18 = vld [vmem:[%s4083_s10 + $0x58] sm:$0xff]   ;;  %s3740_s22 = sshll.u32 %s3821_s9, 4  ;;  %s3741_s22 = int_to_ptr.vmem [resolvable:$false] %s3740_s22 }
  0x86   : > { %v3602_v19 = vld [vmem:[%s4083_s10 + $0xc0] sm:$0xff]   ;;  %v3604_v21 = vld [vmem:[%s4083_s10 + $0xc8] sm:$0xff]   ;;  %v3605_v22 = vld [vmem:[%s4083_s10 + $0xd0] sm:$0xff]   ;;  %p3738_p2 = pnand %p3737_p13, %p3895_p6  ;;  %s3742_s12 = scalar_lea.vmem %s3741_s22, 32 }
  0x87   : > { %v3603_v20 = vld [vmem:[%s4083_s10 + $0x60] sm:$0xff]   ;;  %v3606_v23 = vld [vmem:[%s4083_s10 + $0x138] sm:$0xff]   ;;  %v3610_v27 = vld [vmem:[%s4083_s10 + $0x148] sm:$0xff]   ;;  %p3743_p3 = scmp.lt.s32.totalorder %s2873_s23, %s3741_s22  ;;  %p3744_p4 = scmp.lt.s32.totalorder %s3742_s12, %s3736_s8 }
  0x88   : > { %3251 = vmatpush3.bf16.msra.mxu0 %v3577_v58  ;;  %3311 = vmatpush3.bf16.msra.mxu1 %v3577_v58  ;;  %v3607_v24 = vld [vmem:[%s4083_s10 + $0xd8] sm:$0xff]   ;;  %v3608_v25 = vld [vmem:[%s4083_s10 + $0x140] sm:$0xff]   ;;  %v3611_v28 = vld [vmem:[%s4083_s10 + $0xe8] sm:$0xff]   ;;  %p3739_p7 = pneg %p3738_p2 }
  0x89   : > { %3252 = vmatprep.subr.bf16.mxu0 %v3818_v52  ;;  %3312 = vmatprep.subr.bf16.mxu1 %v3818_v52  ;;  %v3609_v26 = vld [vmem:[%s4083_s10 + $0xe0] sm:$0xff]   ;;  %v3612_v29 = vld [vmem:[%s4083_s10 + $0x150] sm:$0xff]   ;;  %v3614_v31 = vld [vmem:[%s4083_s10 + $0x158] sm:$0xff]   ;;  %p3745_p5 = por %p3744_p4, %p3743_p3 }
  0x8a   : > { %v3613_v30 = vld [vmem:[%s4083_s10 + $0xf0] sm:$0xff]   ;;  %v3615_v32 = vld [vmem:[%s4083_s10 + $0xf8] sm:$0xff]   ;;  %v3616_v33 = vld [vmem:[%s4083_s10 + $0x160] sm:$0xff]  }
  0x8b   : > { %v3617_v34 = vld [vmem:[%s4083_s10 + $0x100] sm:$0xff]   ;;  %v3618_v35 = vld [vmem:[%s4083_s10 + $0x168] sm:$0xff]   ;;  %v3620_v37 = vld [vmem:[%s4083_s10 + $0x170] sm:$0xff]   ;;  %p3746_p0 = pnand %p3745_p5, %p3739_p7 }
  0x8c   : > { %3253 = vmatpush3.bf16.msra.mxu0 %v3578_v59  ;;  %3313 = vmatpush3.bf16.msra.mxu1 %v3578_v59  ;;  %v3619_v36 = vld [vmem:[%s4083_s10 + $0x108] sm:$0xff]   ;;  %v3621_v38 = vld [vmem:[%s4083_s10 + $0x110] sm:$0xff]   ;;  %v3622_v39 = vld [vmem:[%s4083_s10 + $0x178] sm:$0xff]  }
  0x8d   : > { %3366 = vmatprep.subr.bf16.mxu0 %v3818_v52  ;;  %3426 = vmatprep.subr.bf16.mxu1 %v3818_v52  ;;  %v3623_v40 = vld [vmem:[%s4083_s10 + $0x118] sm:$0xff]   ;;  %v3624_v41 = vld [vmem:[%s4083_s10 + $0x180] sm:$0xff]   ;;  %v3626_v43 = vld [vmem:[%s4083_s10 + $0x188] sm:$0xff]  }
  0x8e   : > { %v3625_v42 = vld [vmem:[%s4083_s10 + $0x120] sm:$0xff]   ;;  %v3627_v44 = vld [vmem:[%s4083_s10 + $0x128] sm:$0xff]   ;;  %v3628_v45 = vld [vmem:[%s4083_s10 + $0x190] sm:$0xff]  }
  0x8f   : > { %3255 = vmatmul.mubr.msk.bf16.vlgmr.msra.gmra.mxu0 %vm854_vm2, %v3579_v60  ;;  %3315 = vmatmul.mubr.msk.bf16.vlgmr.msra.gmra.mxu1 %vm854_vm2, %v3580_v61  ;;  %v3629_v54 = vld [vmem:[%s4083_s10 + $0x130] sm:$0xff]   ;;  %v3630_v55 = vld [vmem:[%s4083_s10 + $0x198] sm:$0xff]  }
  0x90   : > { %3367 = vmatpush3.bf16.msra.mxu0 %v898_v56  ;;  %3427 = vmatpush3.bf16.msra.mxu1 %v898_v56 }
  0x91   : > { %3258 = vmatprep.mubr.msk.bf16.mxu0 %vm3819_vm0, %v3818_v52  ;;  %3318 = vmatprep.mubr.msk.bf16.mxu1 %vm3819_vm0, %v3818_v52 }
  0x92   : > { %3368 = vmatprep.subr.bf16.mxu0 %v3818_v52  ;;  %3428 = vmatprep.subr.bf16.mxu1 %v3818_v52 }
  0x94   : > { %3369 = vmatpush3.bf16.msra.mxu0 %v3576_v57  ;;  %3429 = vmatpush3.bf16.msra.mxu1 %v3576_v57 }
  0x95   : > { %3370 = vmatprep.subr.bf16.mxu0 %v3818_v52  ;;  %3430 = vmatprep.subr.bf16.mxu1 %v3818_v52 }
  0x97   : > { %3259 = vmatmul.mubr.msk.bf16.gmra.mxu0 %vm854_vm2, %v3581_v62  ;;  %3319 = vmatmul.mubr.msk.bf16.gmra.mxu1 %vm854_vm2, %v3582_v63 }
  0x98   : > { %3262 = vmatprep.mubr.msk.bf16.mxu0 %vm3819_vm0, %v3818_v52  ;;  %3322 = vmatprep.mubr.msk.bf16.mxu1 %vm3819_vm0, %v3818_v52 }
  0x99   : > { %3371 = vmatpush3.bf16.msra.mxu0 %v3577_v58  ;;  %3431 = vmatpush3.bf16.msra.mxu1 %v3577_v58 }
  0x9a   : > { %3372 = vmatprep.subr.bf16.mxu0 %v3818_v52  ;;  %3432 = vmatprep.subr.bf16.mxu1 %v3818_v52 }
  0x9d   : > { %3373 = vmatpush3.bf16.msra.mxu0 %v3578_v59  ;;  %3433 = vmatpush3.bf16.msra.mxu1 %v3578_v59 }
  0x9f   : > { %3263 = vmatmul.mubr.msk.bf16.gmra.mxu0 %vm854_vm2, %v3583_v0  ;;  %3323 = vmatmul.mubr.msk.bf16.gmra.mxu1 %vm854_vm2, %v3584_v1 }
  0xa0   : > { %3266 = vmatprep.mubr.msk.bf16.mxu0 %vm3819_vm0, %v3818_v52  ;;  %3326 = vmatprep.mubr.msk.bf16.mxu1 %vm3819_vm0, %v3818_v52 }
  0xa7   : > { %3267 = vmatmul.mubr.msk.bf16.gmra.mxu0 %vm854_vm2, %v3585_v2  ;;  %3327 = vmatmul.mubr.msk.bf16.gmra.mxu1 %vm854_vm2, %v3586_v3 }
  0xa8   : > { %3270 = vmatprep.mubr.msk.bf16.mxu0 %vm3819_vm0, %v3818_v52  ;;  %3330 = vmatprep.mubr.msk.bf16.mxu1 %vm3819_vm0, %v3818_v52 }
  0xaf   : > { %3271 = vmatmul.mubr.msk.bf16.gmra.mxu0 %vm854_vm2, %v3587_v4  ;;  %3331 = vmatmul.mubr.msk.bf16.gmra.mxu1 %vm854_vm2, %v3588_v5 }
  0xb0   : > { %3274 = vmatprep.mubr.msk.bf16.mxu0 %vm3819_vm0, %v3818_v52  ;;  %3334 = vmatprep.mubr.msk.bf16.mxu1 %vm3819_vm0, %v3818_v52 }
  0xb7   : > { %3275 = vmatmul.mubr.msk.bf16.gmra.mxu0 %vm854_vm2, %v3589_v6  ;;  %3335 = vmatmul.mubr.msk.bf16.gmra.mxu1 %vm854_vm2, %v3590_v7 }
  0xb8   : > { %3278 = vmatprep.mubr.msk.bf16.mxu0 %vm3819_vm0, %v3818_v52  ;;  %3338 = vmatprep.mubr.msk.bf16.mxu1 %vm3819_vm0, %v3818_v52 }
  0xbf   : > { %3279 = vmatmul.mubr.msk.bf16.gmra.mxu0 %vm854_vm2, %v3591_v8  ;;  %3339 = vmatmul.mubr.msk.bf16.gmra.mxu1 %vm854_vm2, %v3592_v9 }
  0xc0   : > { %3282 = vmatprep.mubr.msk.bf16.mxu0 %vm3819_vm0, %v3818_v52  ;;  %3342 = vmatprep.mubr.msk.bf16.mxu1 %vm3819_vm0, %v3818_v52 }
  0xc7   : > { %3283 = vmatmul.mubr.msk.bf16.gmra.mxu0 %vm854_vm2, %v3593_v10  ;;  %3343 = vmatmul.mubr.msk.bf16.gmra.mxu1 %vm854_vm2, %v3594_v11 }
  0xc8   : > { %3286 = vmatprep.mubr.msk.bf16.mxu0 %vm3819_vm0, %v3818_v52  ;;  %3346 = vmatprep.mubr.msk.bf16.mxu1 %vm3819_vm0, %v3818_v52 }
  0xcf   : > { %3287 = vmatmul.mubr.msk.bf16.gmra.mxu0 %vm854_vm2, %v3595_v12  ;;  %3347 = vmatmul.mubr.msk.bf16.gmra.mxu1 %vm854_vm2, %v3596_v13 }
  0xd0   : > { %3290 = vmatprep.mubr.msk.bf16.mxu0 %vm3819_vm0, %v3818_v52  ;;  %3350 = vmatprep.mubr.msk.bf16.mxu1 %vm3819_vm0, %v3818_v52 }
  0xd7   : > { %3291 = vmatmul.mubr.msk.bf16.gmra.mxu0 %vm854_vm2, %v3597_v14  ;;  %3351 = vmatmul.mubr.msk.bf16.gmra.mxu1 %vm854_vm2, %v3598_v15 }
  0xd8   : > { %3294 = vmatprep.mubr.msk.bf16.mxu0 %vm3819_vm0, %v3818_v52  ;;  %3354 = vmatprep.mubr.msk.bf16.mxu1 %vm3819_vm0, %v3818_v52 }
  0xdf   : > { %3295 = vmatmul.mubr.msk.bf16.gmra.mxu0 %vm854_vm2, %v3599_v16  ;;  %3355 = vmatmul.mubr.msk.bf16.gmra.mxu1 %vm854_vm2, %v3600_v17 }
  0xe0   : > { %3298 = vmatprep.mubr.msk.bf16.mxu0 %vm3819_vm0, %v3818_v52  ;;  %3358 = vmatprep.mubr.msk.bf16.mxu1 %vm3819_vm0, %v3818_v52 }
  0xe7   : > { %3299 = vmatmul.mubr.msk.bf16.gmra.mxu0 %vm854_vm2, %v3601_v18  ;;  %3359 = vmatmul.mubr.msk.bf16.gmra.mxu1 %vm854_vm2, %v3602_v19 }
  0xe8   : > { %3302 = vmatprep.mubr.msk.bf16.mxu0 %vm3819_vm0, %v3818_v52  ;;  %3362 = vmatprep.mubr.msk.bf16.mxu1 %vm3819_vm0, %v3818_v52 }
  0xef   : > { %3303 = vmatmul.mubr.msk.bf16.gmra.mxu0 %vm854_vm2, %v3603_v20  ;;  %3363 = vmatmul.mubr.msk.bf16.gmra.mxu1 %vm854_vm2, %v3604_v21 }
  0xf0   : > { %3374 = vmatprep.mubr.msk.bf16.mxu0 %vm3819_vm0, %v3818_v52  ;;  %3434 = vmatprep.mubr.msk.bf16.mxu1 %vm3819_vm0, %v3818_v52 }
  0xf7   : > { %3375 = vmatmul.mubr.msk.bf16.vlgmr.msra.gmra.mxu0 %vm854_vm2, %v3605_v22  ;;  %3435 = vmatmul.mubr.msk.bf16.vlgmr.msra.gmra.mxu1 %vm854_vm2, %v3606_v23 }
  0xf8   : > { %3378 = vmatprep.mubr.msk.bf16.mxu0 %vm3819_vm0, %v3818_v52  ;;  %3438 = vmatprep.mubr.msk.bf16.mxu1 %vm3819_vm0, %v3818_v52 }
  0xff   : > { %3379 = vmatmul.mubr.msk.bf16.gmra.mxu0 %vm854_vm2, %v3607_v24  ;;  %3439 = vmatmul.mubr.msk.bf16.gmra.mxu1 %vm854_vm2, %v3608_v25 }
 0x100   : > { %3382 = vmatprep.mubr.msk.bf16.mxu0 %vm3819_vm0, %v3818_v52  ;;  %3442 = vmatprep.mubr.msk.bf16.mxu1 %vm3819_vm0, %v3818_v52 }
 0x107   : > { %3383 = vmatmul.mubr.msk.bf16.gmra.mxu0 %vm854_vm2, %v3609_v26  ;;  %3443 = vmatmul.mubr.msk.bf16.gmra.mxu1 %vm854_vm2, %v3610_v27 }
 0x108   : > { %3386 = vmatprep.mubr.msk.bf16.mxu0 %vm3819_vm0, %v3818_v52  ;;  %3446 = vmatprep.mubr.msk.bf16.mxu1 %vm3819_vm0, %v3818_v52 }
 0x10f   : > { %3387 = vmatmul.mubr.msk.bf16.gmra.mxu0 %vm854_vm2, %v3611_v28  ;;  %3447 = vmatmul.mubr.msk.bf16.gmra.mxu1 %vm854_vm2, %v3612_v29 }
 0x110   : > { %3390 = vmatprep.mubr.msk.bf16.mxu0 %vm3819_vm0, %v3818_v52  ;;  %3450 = vmatprep.mubr.msk.bf16.mxu1 %vm3819_vm0, %v3818_v52 }
 0x117   : > { %3391 = vmatmul.mubr.msk.bf16.gmra.mxu0 %vm854_vm2, %v3613_v30  ;;  %3451 = vmatmul.mubr.msk.bf16.gmra.mxu1 %vm854_vm2, %v3614_v31 }
 0x118   : > { %3394 = vmatprep.mubr.msk.bf16.mxu0 %vm3819_vm0, %v3818_v52  ;;  %3454 = vmatprep.mubr.msk.bf16.mxu1 %vm3819_vm0, %v3818_v52 }
 0x11f   : > { %3395 = vmatmul.mubr.msk.bf16.gmra.mxu0 %vm854_vm2, %v3615_v32  ;;  %3455 = vmatmul.mubr.msk.bf16.gmra.mxu1 %vm854_vm2, %v3616_v33 }
 0x120   : > { %3398 = vmatprep.mubr.msk.bf16.mxu0 %vm3819_vm0, %v3818_v52  ;;  %3458 = vmatprep.mubr.msk.bf16.mxu1 %vm3819_vm0, %v3818_v52 }
 0x127   : > { %3399 = vmatmul.mubr.msk.bf16.gmra.mxu0 %vm854_vm2, %v3617_v34  ;;  %3459 = vmatmul.mubr.msk.bf16.gmra.mxu1 %vm854_vm2, %v3618_v35 }
 0x128   : > { %3402 = vmatprep.mubr.msk.bf16.mxu0 %vm3819_vm0, %v3818_v52  ;;  %3462 = vmatprep.mubr.msk.bf16.mxu1 %vm3819_vm0, %v3818_v52 }
 0x12f   : > { %3403 = vmatmul.mubr.msk.bf16.gmra.mxu0 %vm854_vm2, %v3619_v36  ;;  %3463 = vmatmul.mubr.msk.bf16.gmra.mxu1 %vm854_vm2, %v3620_v37 }
 0x130   : > { %3406 = vmatprep.mubr.msk.bf16.mxu0 %vm3819_vm0, %v3818_v52  ;;  %3466 = vmatprep.mubr.msk.bf16.mxu1 %vm3819_vm0, %v3818_v52 }
 0x137   : > { %3407 = vmatmul.mubr.msk.bf16.gmra.mxu0 %vm854_vm2, %v3621_v38  ;;  %3467 = vmatmul.mubr.msk.bf16.gmra.mxu1 %vm854_vm2, %v3622_v39 }
 0x138   : > { %3410 = vmatprep.mubr.msk.bf16.mxu0 %vm3819_vm0, %v3818_v52  ;;  %3470 = vmatprep.mubr.msk.bf16.mxu1 %vm3819_vm0, %v3818_v52 }
 0x13f   : > { %3411 = vmatmul.mubr.msk.bf16.gmra.mxu0 %vm854_vm2, %v3623_v40  ;;  %3471 = vmatmul.mubr.msk.bf16.gmra.mxu1 %vm854_vm2, %v3624_v41 }
 0x140   : > { %3414 = vmatprep.mubr.msk.bf16.mxu0 %vm3819_vm0, %v3818_v52  ;;  %3474 = vmatprep.mubr.msk.bf16.mxu1 %vm3819_vm0, %v3818_v52 }
 0x147   : > { %3415 = vmatmul.mubr.msk.bf16.gmra.mxu0 %vm854_vm2, %v3625_v42  ;;  %3475 = vmatmul.mubr.msk.bf16.gmra.mxu1 %vm854_vm2, %v3626_v43 }
 0x148   : > { %3418 = vmatprep.mubr.msk.bf16.mxu0 %vm3819_vm0, %v3818_v52  ;;  %3478 = vmatprep.mubr.msk.bf16.mxu1 %vm3819_vm0, %v3818_v52 }
 0x14f   : > { %v4311_v46 = vpop.f32.mrf.mxu0  ;;  %v4313_v47 = vpop.f32.mrf.mxu1  ;;  %3419 = vmatmul.mubr.msk.bf16.gmra.mxu0 %vm854_vm2, %v3627_v44  ;;  %3479 = vmatmul.mubr.msk.bf16.gmra.mxu1 %vm854_vm2, %v3628_v45 }
 0x150   : > { %v1305_v48 = vmax.f32 %v4311_v46, %v4313_v47  ;;  %3422 = vmatprep.mubr.msk.bf16.mxu0 %vm3819_vm0, %v3818_v52  ;;  %3482 = vmatprep.mubr.msk.bf16.mxu1 %vm3819_vm0, %v3818_v52  ;;  %v4480_v52 = vld [vmem:[#allocation6] ss:$0 sm:$0xff]  ;;  %v2064_v46 = vld [vmem:[#allocation8 + $0xd0] sm:$0xff]  ;;  %v2150_v47 = vld [vmem:[#allocation8 + $0x1a0] sm:$0xff] }
 0x151   : > { %v3256_v49 = vpop.f32.mrf.mxu0  ;;  %v3316_v50 = vpop.f32.mrf.mxu1 }
 0x153   : > { %v4323_v51 = vpop.f32.mrf.mxu0  ;;  %v4325_v53 = vpop.f32.mrf.mxu1 }
 0x154   : > { %v5103_v11 = vmax.f32 %v4323_v51, %v4325_v53  ;;  %v2752_v51 = vld [vmem:[#allocation8 + $0x750] sm:$0xff] }
 0x155   : > { %v3257_v57 = vpop.f32.mrf.mxu0  ;;  %v3317_v58 = vpop.f32.mrf.mxu1 }
 0x157   : > { %v4331_v59 = vpop.f32.mrf.mxu0  ;;  %v4333_v60 = vpop.f32.mrf.mxu1  ;;  %3423 = vmatmul.mubr.msk.bf16.gmra.mxu0 %vm854_vm2, %v3629_v54  ;;  %3483 = vmatmul.mubr.msk.bf16.gmra.mxu1 %vm854_vm2, %v3630_v55 }
 0x159   : > { %v3260_v61 = vpop.f32.mrf.mxu0  ;;  %v3320_v62 = vpop.f32.mrf.mxu1 }
 0x15b   : > { %v4339_v63 = vpop.f32.mrf.mxu0  ;;  %v4341_v0 = vpop.f32.mrf.mxu1 }
 0x15d   : > { %v3261_v2 = vpop.f32.mrf.mxu0  ;;  %v3321_v3 = vpop.f32.mrf.mxu1 }
 0x15f   : > { %v4345_v4 = vpop.f32.mrf.mxu0  ;;  %v4347_v5 = vpop.f32.mrf.mxu1 }
 0x161   : > { %v3264_v7 = vpop.f32.mrf.mxu0  ;;  %v3324_v8 = vpop.f32.mrf.mxu1 }
 0x163   : > { %v4351_v9 = vpop.f32.mrf.mxu0  ;;  %v4353_v10 = vpop.f32.mrf.mxu1 }
 0x165   : > { %v3265_v12 = vpop.f32.mrf.mxu0  ;;  %v3325_v13 = vpop.f32.mrf.mxu1 }
 0x167   : > { %v4357_v14 = vpop.f32.mrf.mxu0  ;;  %v4359_v15 = vpop.f32.mrf.mxu1 }
 0x169   : > { %v3268_v17 = vpop.f32.mrf.mxu0  ;;  %v3328_v18 = vpop.f32.mrf.mxu1 }
 0x16b   : > { %v4363_v19 = vpop.f32.mrf.mxu0  ;;  %v4365_v20 = vpop.f32.mrf.mxu1 }
 0x16d   : > { %v3269_v22 = vpop.f32.mrf.mxu0  ;;  %v3329_v23 = vpop.f32.mrf.mxu1 }
 0x16f   : > { %v4369_v24 = vpop.f32.mrf.mxu0  ;;  %v4371_v25 = vpop.f32.mrf.mxu1 }
 0x171   : > { %v3272_v27 = vpop.f32.mrf.mxu0  ;;  %v3332_v28 = vpop.f32.mrf.mxu1 }
 0x173   : > { %v4375_v29 = vpop.f32.mrf.mxu0  ;;  %v4377_v30 = vpop.f32.mrf.mxu1 }
 0x175   : > { %v3273_v32 = vpop.f32.mrf.mxu0  ;;  %v3333_v33 = vpop.f32.mrf.mxu1 }
 0x177   : > { %v4381_v34 = vpop.f32.mrf.mxu0  ;;  %v4383_v35 = vpop.f32.mrf.mxu1 }
 0x179   : > { %v3276_v37 = vpop.f32.mrf.mxu0  ;;  %v3336_v38 = vpop.f32.mrf.mxu1 }
 0x17b   : > { %v4387_v39 = vpop.f32.mrf.mxu0  ;;  %v4389_v40 = vpop.f32.mrf.mxu1 }
 0x17d   : > { %v3277_v42 = vpop.f32.mrf.mxu0  ;;  %v3337_v43 = vpop.f32.mrf.mxu1 }
 0x17f   : > { %v4393_v44 = vpop.f32.mrf.mxu0  ;;  %v4395_v45 = vpop.f32.mrf.mxu1 }
 0x181   : > { %v3280_v50 = vpop.f32.mrf.mxu0  ;;  %v3340_v54 = vpop.f32.mrf.mxu1 }
 0x183   : > { %v4399_v55 = vpop.f32.mrf.mxu0  ;;  %v4401_v57 = vpop.f32.mrf.mxu1 }
 0x184   : > { %5077 = vst [vmem:[#allocation16_spill] sm:$0xff] %v4399_v55  ;;  %5078 = vst [vmem:[#allocation17_spill] sm:$0xff] %v4401_v57 }
 0x185   : > { %v3281_v61 = vpop.f32.mrf.mxu0  ;;  %v3341_v62 = vpop.f32.mrf.mxu1 }
 0x187   : > { %v4405_v2 = vpop.f32.mrf.mxu0  ;;  %v4407_v3 = vpop.f32.mrf.mxu1 }
 0x188   : > { %5079 = vst [vmem:[#allocation18_spill] sm:$0xff] %v4405_v2  ;;  %5080 = vst [vmem:[#allocation19_spill] sm:$0xff] %v4407_v3 }
 0x189   : > { %v3284_v8 = vpop.f32.mrf.mxu0  ;;  %v3344_v12 = vpop.f32.mrf.mxu1 }
 0x18b   : > { %v4411_v13 = vpop.f32.mrf.mxu0  ;;  %v4413_v17 = vpop.f32.mrf.mxu1 }
 0x18c   : > { %5081 = vst [vmem:[#allocation20_spill] sm:$0xff] %v4411_v13  ;;  %5082 = vst [vmem:[#allocation21_spill] sm:$0xff] %v4413_v17 }
 0x18d   : > { %v3285_v22 = vpop.f32.mrf.mxu0  ;;  %v3345_v23 = vpop.f32.mrf.mxu1 }
 0x18f   : > { %v4417_v27 = vpop.f32.mrf.mxu0  ;;  %v4419_v28 = vpop.f32.mrf.mxu1 }
 0x190   : > { %5083 = vst [vmem:[#allocation22_spill] sm:$0xff] %v4417_v27  ;;  %5084 = vst [vmem:[#allocation23_spill] sm:$0xff] %v4419_v28  ;;  %v2581_v28 = vld [vmem:[#allocation8 + $0x5b8] sm:$0xff] }
 0x191   : > { %v3288_v33 = vpop.f32.mrf.mxu0  ;;  %v3348_v37 = vpop.f32.mrf.mxu1 }
 0x193   : > { %v4423_v38 = vpop.f32.mrf.mxu0  ;;  %v4425_v42 = vpop.f32.mrf.mxu1 }
 0x194   : > { %5085 = vst [vmem:[#allocation24_spill] sm:$0xff] %v4423_v38  ;;  %5086 = vst [vmem:[#allocation25_spill] sm:$0xff] %v4425_v42  ;;  %v2495_v38 = vld [vmem:[#allocation8 + $0x4e8] sm:$0xff] }
 0x195   : > { %v3289_v50 = vpop.f32.mrf.mxu0  ;;  %v3349_v54 = vpop.f32.mrf.mxu1 }
 0x197   : > { %v4429_v61 = vpop.f32.mrf.mxu0  ;;  %v4431_v62 = vpop.f32.mrf.mxu1 }
 0x198   : > { %5087 = vst [vmem:[#allocation26_spill] sm:$0xff] %v4429_v61  ;;  %5088 = vst [vmem:[#allocation27_spill] sm:$0xff] %v4431_v62 }
 0x199   : > { %v3292_v12 = vpop.f32.mrf.mxu0  ;;  %v3352_v22 = vpop.f32.mrf.mxu1 }
 0x19b   : > { %v4435_v23 = vpop.f32.mrf.mxu0  ;;  %v4437_v33 = vpop.f32.mrf.mxu1 }
 0x19c   : > { %5089 = vst [vmem:[#allocation28_spill] sm:$0xff] %v4435_v23  ;;  %5090 = vst [vmem:[#allocation29_spill] sm:$0xff] %v4437_v33  ;;  %v2237_v33 = vld [vmem:[#allocation8 + $0x278] sm:$0xff]  ;;  %v2323_v23 = vld [vmem:[#allocation8 + $0x348] sm:$0xff] }
 0x19d   : > { %v3293_v32 = vpop.f32.mrf.mxu0  ;;  %v3353_v43 = vpop.f32.mrf.mxu1 }
 0x19f   : > { %v4441_v50 = vpop.f32.mrf.mxu0  ;;  %v4443_v54 = vpop.f32.mrf.mxu1 }
 0x1a0   : > { %5091 = vst [vmem:[#allocation30_spill] sm:$0xff] %v4441_v50  ;;  %5092 = vst [vmem:[#allocation31_spill] sm:$0xff] %v4443_v54  ;;  %v2151_v50 = vld [vmem:[#allocation8 + $0x1a8] sm:$0xff] }
 0x1a1   : > { %v3296_v7 = vpop.f32.mrf.mxu0  ;;  %v3356_v8 = vpop.f32.mrf.mxu1 }
 0x1a3   : > { %v4447_v12 = vpop.f32.mrf.mxu0  ;;  %v4449_v22 = vpop.f32.mrf.mxu1 }
 0x1a4   : > { %5093 = vst [vmem:[#allocation32_spill] sm:$0xff] %v4447_v12  ;;  %5094 = vst [vmem:[#allocation33_spill] sm:$0xff] %v4449_v22 }
 0x1a5   : > { %v3297_v49 = vpop.f32.mrf.mxu0  ;;  %v3357_v37 = vpop.f32.mrf.mxu1 }
 0x1a7   : > { %v4453_v32 = vpop.f32.mrf.mxu0  ;;  %v4455_v43 = vpop.f32.mrf.mxu1 }
 0x1a8   : > { %5095 = vst [vmem:[#allocation34_spill] sm:$0xff] %v4453_v32  ;;  %5096 = vst [vmem:[#allocation35_spill] sm:$0xff] %v4455_v43  ;;  %v2580_v43 = vld [vmem:[#allocation8 + $0x5b0] sm:$0xff]  ;;  %v2666_v32 = vld [vmem:[#allocation8 + $0x680] sm:$0xff] }
 0x1a9   : > { %v3300_v36 = vpop.f32.mrf.mxu0  ;;  %v3360_v18 = vpop.f32.mrf.mxu1 }
 0x1ab   : > { %v4459_v7 = vpop.f32.mrf.mxu0  ;;  %v4461_v8 = vpop.f32.mrf.mxu1 }
 0x1ac   : > { %5097 = vst [vmem:[#allocation36_spill] sm:$0xff] %v4459_v7  ;;  %5098 = vst [vmem:[#allocation37_spill] sm:$0xff] %v4461_v8  ;;  %v1978_v7 = vld [vmem:[#allocation8] sm:$0xff] }
 0x1ad   : > { %v3301_v26 = vpop.f32.mrf.mxu0  ;;  %v3361_v58 = vpop.f32.mrf.mxu1 }
 0x1af   : > { %v4465_v49 = vpop.f32.mrf.mxu0  ;;  %v4467_v37 = vpop.f32.mrf.mxu1 }
 0x1b0   : > { %5099 = vst [vmem:[#allocation38_spill] sm:$0xff] %v4465_v49  ;;  %5100 = vst [vmem:[#allocation39_spill] sm:$0xff] %v4467_v37 }
 0x1b1   : > { %v3304_v16 = vpop.f32.mrf.mxu0  ;;  %v3364_v41 = vpop.f32.mrf.mxu1 }
 0x1b3   : > { %v4471_v36 = vpop.f32.mrf.mxu0  ;;  %v4473_v18 = vpop.f32.mrf.mxu1 }
 0x1b4   : > { %5101 = vst [vmem:[#allocation40_spill] sm:$0xff] %v4471_v36  ;;  %5102 = vst [vmem:[#allocation41_spill] sm:$0xff] %v4473_v18 }
 0x1b5   : > { %v3305_v6 = vpop.f32.mrf.mxu0  ;;  %v3365_v31 = vpop.f32.mrf.mxu1 }
 0x1b7   : > { %v1496_v26 = vpop.f32.mrf.mxu0  ;;  %v1790_v58 = vpop.f32.mrf.mxu1 }
 0x1b8   : > { %v1599_v1 = vmax.f32 %v1305_v48, %v1496_v26 }
 0x1b9   : > { %v3376_v21 = vpop.f32.mrf.mxu0  ;;  %v3436_v16 = vpop.f32.mrf.mxu1 }
 0x1ba   : > { %v1893_v41 = vmax.f32 %v1599_v1, %v1790_v58  ;;  %v2236_v21 = vld [vmem:[#allocation8 + $0x270] sm:$0xff]  ;;  %v2322_v16 = vld [vmem:[#allocation8 + $0x340] sm:$0xff] }
 0x1bb   : > { %v1499_v56 = vpop.f32.mrf.mxu0  ;;  %v1793_v37 = vpop.f32.mrf.mxu1  ;;  %v2408_v1 = vld [vmem:[#allocation8 + $0x410] sm:$0xff]  ;;  %v2494_v58 = vld [vmem:[#allocation8 + $0x4e0] sm:$0xff] }
 0x1bc   : > { %v1926_v49 = vadd.f32 %v4480_v52, %v1893_v41  ;;  %v1600_v6 = vmax.f32 %v5103_v11, %v1499_v56  ;;  %v1979_v56 = vld [vmem:[#allocation8 + $0x8] sm:$0xff]  ;;  %v2065_v11 = vld [vmem:[#allocation8 + $0xd8] sm:$0xff] }
 0x1bd   : > { %v3377_v31 = vpop.f32.mrf.mxu0  ;;  %v3437_v18 = vpop.f32.mrf.mxu1 }
 0x1be   : > { %v1952_v36 = vmax.f32 %v1926_v49, 0.0  ;;  %v1894_v8 = vmax.f32 %v1600_v6, %v1793_v37  ;;  %v5104_v49 = vmax.f32 %v4331_v59, %v4333_v60  ;;  %v2667_v59 = vld [vmem:[#allocation8 + $0x688] sm:$0xff]  ;;  %v2753_v60 = vld [vmem:[#allocation8 + $0x758] sm:$0xff] }
 0x1bf   : > { %v1504_v48 = vpop.f32.mrf.mxu0  ;;  %v1798_v26 = vpop.f32.mrf.mxu1 }
 0x1c0   : > { %v2004_v12 = vmul.f32 %v1978_v7, %v1952_v36  ;;  %v1927_v53 = vadd.f32 %v4480_v52, %v1894_v8  ;;  %v1601_v37 = vmax.f32 %v5104_v49, %v1504_v48  ;;  %v2090_v18 = vmul.f32 %v2064_v46, %v1952_v36  ;;  %v2409_v8 = vld [vmem:[#allocation8 + $0x418] sm:$0xff] }
 0x1c1   : > { %v3380_v41 = vpop.f32.mrf.mxu0  ;;  %v3440_v22 = vpop.f32.mrf.mxu1  ;;  %v2176_v6 = vmul.f32 %v2150_v47, %v1952_v36  ;;  %v2262_v31 = vmul.f32 %v2236_v21, %v1952_v36  ;;  %v2348_v54 = vmul.f32 %v2322_v16, %v1952_v36  ;;  %v2520_v7 = vmul.f32 %v2494_v58, %v1952_v36 }
 0x1c2   : > { %v2434_v22 = vmul.f32 %v2408_v1, %v1952_v36  ;;  %v2606_v61 = vmul.f32 %v2580_v43, %v1952_v36  ;;  %v1953_v42 = vmax.f32 %v1927_v53, 0.0  ;;  %v2692_v27 = vmul.f32 %v2666_v32, %v1952_v36 }
 0x1c3   : > { %v1507_v62 = vpop.f32.mrf.mxu0  ;;  %v1801_v41 = vpop.f32.mrf.mxu1  ;;  %v2778_v17 = vmul.f32 %v2752_v51, %v1952_v36  ;;  %v1895_v46 = vmax.f32 %v1601_v37, %v1798_v26  ;;  %v5105_v47 = vmax.f32 %v4339_v63, %v4341_v0 }
 0x1c4   : > { %v2005_v49 = vmul.f32 %v1979_v56, %v1953_v42  ;;  %v2091_v13 = vmul.f32 %v2065_v11, %v1953_v42  ;;  %v2177_v1 = vmul.f32 %v2151_v50, %v1953_v42  ;;  %v2263_v58 = vmul.f32 %v2237_v33, %v1953_v42  ;;  %v1980_v56 = vld [vmem:[#allocation8 + $0x10] sm:$0xff] }
 0x1c5   : > { %v1602_v48 = vmax.f32 %v5105_v47, %v1507_v62  ;;  %v3381_v21 = vpop.f32.mrf.mxu0  ;;  %v3441_v16 = vpop.f32.mrf.mxu1  ;;  %v2349_v43 = vmul.f32 %v2323_v23, %v1953_v42  ;;  %v2435_v53 = vmul.f32 %v2409_v8, %v1953_v42  ;;  %v2521_v3 = vmul.f32 %v2495_v38, %v1953_v42  ;;  %v2152_v11 = vld [vmem:[#allocation8 + $0x1b0] sm:$0xff] }
 0x1c6   : > { %v2607_v2 = vmul.f32 %v2581_v28, %v1953_v42  ;;  %v2116_v36 = vadd.f32 %v2091_v13, %v2090_v18  ;;  %v2288_v51 = vadd.f32 %v2263_v58, %v2262_v31  ;;  %v2693_v55 = vmul.f32 %v2667_v59, %v1953_v42  ;;  %v2153_v58 = vld [vmem:[#allocation8 + $0x1b8] sm:$0xff] }
 0x1c7   : > { %v1512_v57 = vpop.f32.mrf.mxu0  ;;  %v1806_v32 = vpop.f32.mrf.mxu1  ;;  %v2779_v26 = vmul.f32 %v2753_v60, %v1953_v42  ;;  %v4493_v37 = vadd.f32 %v2349_v43, %v2348_v54  ;;  %v4495_v63 = vadd.f32 %v2435_v53, %v2434_v22  ;;  %v4497_v0 = vadd.f32 %v2521_v3, %v2520_v7  ;;  %v1981_v43 = vld [vmem:[#allocation8 + $0x18] sm:$0xff]  ;;  %v2239_v53 = vld [vmem:[#allocation8 + $0x288] sm:$0xff] }
 0x1c8   : > { %v4499_v62 = vadd.f32 %v2607_v2, %v2606_v61  ;;  %v4501_v23 = vadd.f32 %v2693_v55, %v2692_v27  ;;  %v1928_v28 = vadd.f32 %v4480_v52, %v1895_v46  ;;  %v1896_v13 = vmax.f32 %v1602_v48, %v1801_v41  ;;  %v2066_v27 = vld [vmem:[#allocation8 + $0xe0] sm:$0xff] }
 0x1c9   : > { %v3384_v50 = vpop.f32.mrf.mxu0  ;;  %v3444_v33 = vpop.f32.mrf.mxu1  ;;  %v4503_v38 = vadd.f32 %v2779_v26, %v2778_v17  ;;  %v5106_v42 = vmax.f32 %v4345_v4, %v4347_v5  ;;  %v2202_v31 = vadd.f32 %v2177_v1, %v2176_v6  ;;  %v2030_v2 = vadd.f32 %v2005_v49, %v2004_v12  ;;  %v2238_v17 = vld [vmem:[#allocation8 + $0x280] sm:$0xff] }
 0x1ca   : > { %v4509_v61 = vmax.f32 %v1928_v28, 0.0  ;;  %v1929_v55 = vadd.f32 %v4480_v52, %v1896_v13  ;;  %v5107_v41 = vmax.f32 %v4351_v9, %v4353_v10  ;;  %v5108_v9 = vmax.f32 %v4357_v14, %v4359_v15  ;;  %v2154_v14 = vld [vmem:[#allocation8 + $0x1c0] sm:$0xff] }
 0x1cb   : > { %v1603_v54 = vmax.f32 %v5106_v42, %v1512_v57  ;;  %v1515_v18 = vpop.f32.mrf.mxu0  ;;  %v1809_v3 = vpop.f32.mrf.mxu1  ;;  %v5109_v13 = vmax.f32 %v4363_v19, %v4365_v20  ;;  %v1982_v15 = vld [vmem:[#allocation8 + $0x20] sm:$0xff] }
 0x1cc   : > { %v1604_v7 = vmax.f32 %v5107_v41, %v1515_v18  ;;  %v2006_v4 = vmul.f32 %v1980_v56, %v4509_v61  ;;  %v2178_v5 = vmul.f32 %v2152_v11, %v4509_v61  ;;  %v2092_v12 = vmul.f32 %v2066_v27, %v4509_v61 }
 0x1cd   : > { %v1897_v22 = vmax.f32 %v1603_v54, %v1806_v32  ;;  %v3385_v8 = vpop.f32.mrf.mxu0  ;;  %v3445_v59 = vpop.f32.mrf.mxu1  ;;  %v2264_v60 = vmul.f32 %v2238_v17, %v4509_v61  ;;  %v4519_v46 = vmax.f32 %v1929_v55, 0.0 }
 0x1ce   : > { %v1898_v48 = vmax.f32 %v1604_v7, %v1809_v3  ;;  %v2203_v49 = vadd.f32 %v2202_v31, %v2178_v5  ;;  %v2031_v1 = vadd.f32 %v2030_v2, %v2006_v4  ;;  %v4533_v31 = vadd.f32 %v2116_v36, %v2092_v12  ;;  %v1983_v8 = vld [vmem:[#allocation8 + $0x28] sm:$0xff] }
 0x1cf   : > { %v1520_v57 = vpop.f32.mrf.mxu0  ;;  %v1814_v6 = vpop.f32.mrf.mxu1  ;;  %v1930_v47 = vadd.f32 %v4480_v52, %v1897_v22  ;;  %v2179_v54 = vmul.f32 %v2153_v58, %v4519_v46  ;;  %v2007_v18 = vmul.f32 %v1981_v43, %v4519_v46  ;;  %v2289_v3 = vadd.f32 %v2288_v51, %v2264_v60  ;;  %v2155_v22 = vld [vmem:[#allocation8 + $0x1c8] sm:$0xff] }
 0x1d0   : > { %v1605_v10 = vmax.f32 %v5108_v9, %v1520_v57  ;;  %v1931_v33 = vadd.f32 %v4480_v52, %v1898_v48  ;;  %v2265_v2 = vmul.f32 %v2239_v53, %v4519_v46  ;;  %v5110_v5 = vmax.f32 %v4369_v24, %v4371_v25  ;;  %v1984_v48 = vld [vmem:[#allocation8 + $0x30] sm:$0xff]  ;;  %v2067_v9 = vld [vmem:[#allocation8 + $0xe8] sm:$0xff]  ;;  %v2241_v25 = vld [vmem:[#allocation8 + $0x298] sm:$0xff] }
 0x1d1   : > { %v3388_v21 = vpop.f32.mrf.mxu0  ;;  %v3448_v16 = vpop.f32.mrf.mxu1  ;;  %v4525_v50 = vmax.f32 %v1930_v47, 0.0  ;;  %v2204_v7 = vadd.f32 %v2203_v49, %v2179_v54  ;;  %v2032_v4 = vadd.f32 %v2031_v1, %v2007_v18  ;;  %v2156_v47 = vld [vmem:[#allocation8 + $0x1d0] sm:$0xff]  ;;  %v2093_v18 = vmul.f32 %v2067_v9, %v4519_v46 }
 0x1d2   : > { %v1899_v28 = vmax.f32 %v1605_v10, %v1814_v6  ;;  %v4536_v55 = vmax.f32 %v1931_v33, 0.0  ;;  %v2410_v6 = vld [vmem:[#allocation8 + $0x420] sm:$0xff]  ;;  %v2411_v10 = vld [vmem:[#allocation8 + $0x428] sm:$0xff]  ;;  %v2240_v1 = vld [vmem:[#allocation8 + $0x290] sm:$0xff] }
 0x1d3   : > { %v1523_v32 = vpop.f32.mrf.mxu0  ;;  %v1817_v26 = vpop.f32.mrf.mxu1  ;;  %v2180_v41 = vmul.f32 %v2154_v14, %v4525_v50  ;;  %v2008_v59 = vmul.f32 %v1982_v15, %v4525_v50  ;;  %v1985_v15 = vld [vmem:[#allocation8 + $0x38] sm:$0xff]  ;;  %v4558_v54 = vmul.f32 %v2410_v6, %v4509_v61 }
 0x1d4   : > { %v1606_v56 = vmax.f32 %v5109_v13, %v1523_v32  ;;  %v1932_v27 = vadd.f32 %v4480_v52, %v1899_v28  ;;  %v2181_v16 = vmul.f32 %v2155_v22, %v4536_v55  ;;  %v2009_v49 = vmul.f32 %v1983_v8, %v4536_v55 }
 0x1d5   : > { %v3389_v11 = vpop.f32.mrf.mxu0  ;;  %v3449_v42 = vpop.f32.mrf.mxu1  ;;  %v2205_v32 = vadd.f32 %v2204_v7, %v2180_v41  ;;  %v2033_v24 = vadd.f32 %v2032_v4, %v2008_v59  ;;  %v5111_v28 = vmax.f32 %v4375_v29, %v4377_v30  ;;  %v2266_v29 = vmul.f32 %v2240_v1, %v4525_v50  ;;  %v2243_v41 = vld [vmem:[#allocation8 + $0x2a8] sm:$0xff]  ;;  %v2068_v7 = vld [vmem:[#allocation8 + $0xf0] sm:$0xff] }
 0x1d6   : > { %v1900_v17 = vmax.f32 %v1606_v56, %v1817_v26  ;;  %v4541_v51 = vmax.f32 %v1932_v27, 0.0  ;;  %v2290_v26 = vadd.f32 %v2289_v3, %v2265_v2  ;;  %v2157_v56 = vld [vmem:[#allocation8 + $0x1d8] sm:$0xff]  ;;  %v2242_v42 = vld [vmem:[#allocation8 + $0x2a0] sm:$0xff]  ;;  %v4562_v3 = vmul.f32 %v2411_v10, %v4519_v46  ;;  %v2244_v1 = vld [vmem:[#allocation8 + $0x2b0] sm:$0xff] }
 0x1d7   : > { %v1528_v19 = vpop.f32.mrf.mxu0  ;;  %v1822_v20 = vpop.f32.mrf.mxu1  ;;  %v2034_v22 = vadd.f32 %v2033_v24, %v2009_v49  ;;  %v2094_v24 = vmul.f32 %v2068_v7, %v4525_v50  ;;  %v2412_v7 = vld [vmem:[#allocation8 + $0x430] sm:$0xff] }
 0x1d8   : > { %v1933_v36 = vadd.f32 %v4480_v52, %v1900_v17  ;;  %v1607_v57 = vmax.f32 %v5110_v5, %v1528_v19  ;;  %v2182_v14 = vmul.f32 %v2156_v47, %v4541_v51  ;;  %v2010_v11 = vmul.f32 %v1984_v48, %v4541_v51  ;;  %v2158_v19 = vld [vmem:[#allocation8 + $0x1e0] sm:$0xff] }
 0x1d9   : > { %v3392_v12 = vpop.f32.mrf.mxu0  ;;  %v3452_v60 = vpop.f32.mrf.mxu1  ;;  %v2268_v6 = vmul.f32 %v2242_v42, %v4541_v51  ;;  %v5112_v47 = vmax.f32 %v4381_v34, %v4383_v35  ;;  %v2071_v34 = vld [vmem:[#allocation8 + $0x108] sm:$0xff]  ;;  %v2072_v35 = vld [vmem:[#allocation8 + $0x110] sm:$0xff] }
 0x1da   : > { %v1901_v21 = vmax.f32 %v1607_v57, %v1822_v20  ;;  %v4549_v58 = vmax.f32 %v1933_v36, 0.0  ;;  %v2206_v20 = vadd.f32 %v2205_v32, %v2181_v16  ;;  %v1986_v36 = vld [vmem:[#allocation8 + $0x40] sm:$0xff]  ;;  %v2267_v57 = vmul.f32 %v2241_v25, %v4536_v55  ;;  %v2069_v12 = vld [vmem:[#allocation8 + $0xf8] sm:$0xff] }
 0x1db   : > { %v1531_v43 = vpop.f32.mrf.mxu0  ;;  %v1825_v53 = vpop.f32.mrf.mxu1  ;;  %v2035_v10 = vadd.f32 %v2034_v22, %v2010_v11  ;;  %v2070_v32 = vld [vmem:[#allocation8 + $0x100] sm:$0xff] }
 0x1dc   : > { %v1934_v33 = vadd.f32 %v4480_v52, %v1901_v21  ;;  %v1608_v13 = vmax.f32 %v5111_v28, %v1531_v43  ;;  %v2183_v4 = vmul.f32 %v2157_v56, %v4549_v58  ;;  %v2011_v5 = vmul.f32 %v1985_v15, %v4549_v58  ;;  %v2159_v15 = vld [vmem:[#allocation8 + $0x1e8] sm:$0xff] }
 0x1dd   : > { %v3393_v2 = vpop.f32.mrf.mxu0  ;;  %v3453_v27 = vpop.f32.mrf.mxu1  ;;  %v2207_v9 = vadd.f32 %v2206_v20, %v2182_v14  ;;  %v2269_v43 = vmul.f32 %v2243_v41, %v4549_v58  ;;  %v2245_v20 = vld [vmem:[#allocation8 + $0x2b8] sm:$0xff]  ;;  %v2096_v41 = vmul.f32 %v2070_v32, %v4541_v51 }
 0x1de   : > { %v4565_v30 = vmax.f32 %v1934_v33, 0.0  ;;  %v1902_v17 = vmax.f32 %v1608_v13, %v1825_v53  ;;  %v2291_v53 = vadd.f32 %v2290_v26, %v2266_v29  ;;  %v2095_v13 = vmul.f32 %v2069_v12, %v4536_v55 }
 0x1df   : > { %v1536_v8 = vpop.f32.mrf.mxu0  ;;  %v1830_v59 = vpop.f32.mrf.mxu1  ;;  %v2208_v11 = vadd.f32 %v2207_v9, %v2183_v4  ;;  %v2036_v42 = vadd.f32 %v2035_v10, %v2011_v5  ;;  %v2118_v26 = vadd.f32 %v4533_v31, %v2093_v18  ;;  %v5113_v29 = vmax.f32 %v4387_v39, %v4389_v40  ;;  %v2413_v18 = vld [vmem:[#allocation8 + $0x438] sm:$0xff]  ;;  %v2160_v40 = vld [vmem:[#allocation8 + $0x1f0] sm:$0xff] }
 0x1e0   : > { %v1935_v60 = vadd.f32 %v4480_v52, %v1902_v17  ;;  %v1609_v48 = vmax.f32 %v5112_v47, %v1536_v8  ;;  %v2184_v49 = vmul.f32 %v2158_v19, %v4565_v30  ;;  %v2012_v28 = vmul.f32 %v1986_v36, %v4565_v30  ;;  %v1987_v19 = vld [vmem:[#allocation8 + $0x48] sm:$0xff] }
 0x1e1   : > { %v3396_v21 = vpop.f32.mrf.mxu0  ;;  %v3456_v16 = vpop.f32.mrf.mxu1  ;;  %v2292_v2 = vadd.f32 %v2291_v53, %v2267_v57  ;;  %v2270_v22 = vmul.f32 %v2244_v1, %v4565_v30  ;;  %v2097_v5 = vmul.f32 %v2071_v34, %v4549_v58  ;;  %v4591_v31 = vmul.f32 %v2072_v35, %v4565_v30 }
 0x1e2   : > { %v4578_v25 = vmax.f32 %v1935_v60, 0.0  ;;  %v1903_v33 = vmax.f32 %v1609_v48, %v1830_v59  ;;  %v2209_v4 = vadd.f32 %v2208_v11, %v2184_v49  ;;  %v1988_v60 = vld [vmem:[#allocation8 + $0x50] sm:$0xff]  ;;  %v2037_v47 = vadd.f32 %v2036_v42, %v2012_v28  ;;  %v2073_v48 = vld [vmem:[#allocation8 + $0x118] sm:$0xff]  ;;  %v2414_v28 = vld [vmem:[#allocation8 + $0x440] sm:$0xff] }
 0x1e3   : > { %v1539_v56 = vpop.f32.mrf.mxu0  ;;  %v1833_v14 = vpop.f32.mrf.mxu1  ;;  %v2293_v36 = vadd.f32 %v2292_v2, %v2268_v6  ;;  %v4599_v49 = vmul.f32 %v2412_v7, %v4525_v50  ;;  %v5114_v53 = vmax.f32 %v4393_v44, %v4395_v45  ;;  %v2119_v34 = vadd.f32 %v2118_v26, %v2094_v24  ;;  %v2415_v2 = vld [vmem:[#allocation8 + $0x448] sm:$0xff]  ;;  %v2416_v26 = vld [vmem:[#allocation8 + $0x450] sm:$0xff] }
 0x1e4   : > { %v1936_v27 = vadd.f32 %v4480_v52, %v1903_v33  ;;  %v1610_v17 = vmax.f32 %v5113_v29, %v1539_v56  ;;  %v2185_v12 = vmul.f32 %v2159_v15, %v4578_v25  ;;  %v2013_v21 = vmul.f32 %v1987_v19, %v4578_v25  ;;  %v2246_v33 = vld [vmem:[#allocation8 + $0x2c0] sm:$0xff] }
 0x1e5   : > { %v3397_v8 = vpop.f32.mrf.mxu0  ;;  %v3457_v59 = vpop.f32.mrf.mxu1  ;;  %v2271_v6 = vmul.f32 %v2245_v20, %v4578_v25  ;;  %v2294_v16 = vadd.f32 %v2293_v36, %v2269_v43  ;;  %v4606_v35 = vmul.f32 %v2413_v18, %v4536_v55  ;;  %v2099_v42 = vmul.f32 %v2073_v48, %v4578_v25  ;;  %v2074_v29 = vld [vmem:[#allocation8 + $0x120] sm:$0xff]  ;;  %v2161_v20 = vld [vmem:[#allocation8 + $0x1f8] sm:$0xff] }
 0x1e6   : > { %v4593_v57 = vmax.f32 %v1936_v27, 0.0  ;;  %v1904_v39 = vmax.f32 %v1610_v17, %v1833_v14  ;;  %v2210_v45 = vadd.f32 %v2209_v4, %v2185_v12  ;;  %v2120_v24 = vadd.f32 %v2119_v34, %v2095_v13  ;;  %v5115_v18 = vld [vmem:[#allocation16_spill] sm:$0xff]  ;;  %v1989_v4 = vld [vmem:[#allocation8 + $0x58] sm:$0xff] }
 0x1e7   : > { %v1544_v9 = vpop.f32.mrf.mxu0  ;;  %v1838_v10 = vpop.f32.mrf.mxu1  ;;  %v2295_v11 = vadd.f32 %v2294_v16, %v2270_v22  ;;  %v2038_v7 = vadd.f32 %v2037_v47, %v2013_v21  ;;  %v4615_v36 = vmul.f32 %v2414_v28, %v4541_v51  ;;  %v2417_v13 = vld [vmem:[#allocation8 + $0x458] sm:$0xff]  ;;  %v4622_v48 = vmul.f32 %v2415_v2, %v4549_v58  ;;  %v2162_v34 = vld [vmem:[#allocation8 + $0x200] sm:$0xff]  ;;  %v2075_v28 = vld [vmem:[#allocation8 + $0x128] sm:$0xff] }
 0x1e8   : > { %v1937_v1 = vadd.f32 %v4480_v52, %v1904_v39  ;;  %v1611_v32 = vmax.f32 %v5114_v53, %v1544_v9  ;;  %v2186_v15 = vmul.f32 %v2160_v40, %v4593_v57  ;;  %v2014_v43 = vmul.f32 %v1988_v60, %v4593_v57  ;;  %v5116_v39 = vld [vmem:[#allocation17_spill] sm:$0xff] }
 0x1e9   : > { %v3400_v56 = vpop.f32.mrf.mxu0  ;;  %v3460_v14 = vpop.f32.mrf.mxu1  ;;  %v2272_v8 = vmul.f32 %v2246_v33, %v4593_v57  ;;  %v2296_v59 = vadd.f32 %v2295_v11, %v2271_v6  ;;  %v5117_v40 = vmax.f32 %v5115_v18, %v5116_v39  ;;  %v2121_v12 = vadd.f32 %v2120_v24, %v2096_v41  ;;  %v2247_v6 = vld [vmem:[#allocation8 + $0x2c8] sm:$0xff]  ;;  %v5118_v24 = vld [vmem:[#allocation18_spill] sm:$0xff] }
 0x1ea   : > { %v4611_v27 = vmax.f32 %v1937_v1, 0.0  ;;  %v1905_v44 = vmax.f32 %v1611_v32, %v1838_v10  ;;  %v2211_v10 = vadd.f32 %v2210_v45, %v2186_v15  ;;  %v2039_v21 = vadd.f32 %v2038_v7, %v2014_v43  ;;  %v2418_v1 = vld [vmem:[#allocation8 + $0x460] sm:$0xff]  ;;  %v2419_v14 = vld [vmem:[#allocation8 + $0x468] sm:$0xff] }
 0x1eb   : > { %v1547_v17 = vpop.f32.mrf.mxu0  ;;  %v1841_v19 = vpop.f32.mrf.mxu1  ;;  %v2100_v16 = vmul.f32 %v2074_v29, %v4593_v57  ;;  %v4626_v53 = vmul.f32 %v2416_v26, %v4565_v30  ;;  %v2122_v56 = vadd.f32 %v2121_v12, %v2097_v5  ;;  %v2297_v43 = vadd.f32 %v2296_v59, %v2272_v8  ;;  %v5119_v26 = vld [vmem:[#allocation19_spill] sm:$0xff]  ;;  %v2248_v5 = vld [vmem:[#allocation8 + $0x2d0] sm:$0xff]  ;;  %v2163_v12 = vld [vmem:[#allocation8 + $0x208] sm:$0xff] }
 0x1ec   : > { %v1938_v22 = vadd.f32 %v4480_v52, %v1905_v44  ;;  %v1612_v60 = vmax.f32 %v5117_v40, %v1547_v17  ;;  %v2187_v41 = vmul.f32 %v2161_v20, %v4611_v27  ;;  %v2015_v15 = vmul.f32 %v1989_v4, %v4611_v27  ;;  %v1990_v20 = vld [vmem:[#allocation8 + $0x60] sm:$0xff] }
 0x1ed   : > { %v3401_v9 = vpop.f32.mrf.mxu0  ;;  %v3461_v47 = vpop.f32.mrf.mxu1  ;;  %v4633_v44 = vmul.f32 %v2417_v13, %v4578_v25  ;;  %v2461_v45 = vadd.f32 %v4495_v63, %v4558_v54  ;;  %v5120_v17 = vmax.f32 %v5118_v24, %v5119_v26  ;;  %v2123_v7 = vadd.f32 %v2122_v56, %v4591_v31  ;;  %v2076_v63 = vld [vmem:[#allocation8 + $0x130] sm:$0xff]  ;;  %v2249_v26 = vld [vmem:[#allocation8 + $0x2d8] sm:$0xff] }
 0x1ee   : > { %v4628_v32 = vmax.f32 %v1938_v22, 0.0  ;;  %v1906_v33 = vmax.f32 %v1612_v60, %v1841_v19  ;;  %v4643_v22 = vmul.f32 %v2418_v1, %v4593_v57  ;;  %v2273_v39 = vmul.f32 %v2247_v6, %v4611_v27  ;;  %v2420_v9 = vld [vmem:[#allocation8 + $0x470] sm:$0xff] }
 0x1ef   : > { %v1552_v11 = vpop.f32.mrf.mxu0  ;;  %v1846_v2 = vpop.f32.mrf.mxu1  ;;  %v2101_v54 = vmul.f32 %v2075_v28, %v4611_v27  ;;  %v4649_v40 = vmul.f32 %v2419_v14, %v4611_v27  ;;  %v2212_v31 = vadd.f32 %v2211_v10, %v2187_v41  ;;  %v2124_v13 = vadd.f32 %v2123_v7, %v2099_v42  ;;  %v2164_v7 = vld [vmem:[#allocation8 + $0x210] sm:$0xff] }
 0x1f0   : > { %v1939_v29 = vadd.f32 %v4480_v52, %v1906_v33  ;;  %v1613_v19 = vmax.f32 %v5120_v17, %v1552_v11  ;;  %v2188_v18 = vmul.f32 %v2162_v34, %v4628_v32  ;;  %v1991_v33 = vld [vmem:[#allocation8 + $0x68] sm:$0xff]  ;;  %v2016_v34 = vmul.f32 %v1990_v20, %v4628_v32 }
 0x1f1   : > { %v3404_v8 = vpop.f32.mrf.mxu0  ;;  %v3464_v59 = vpop.f32.mrf.mxu1  ;;  %v2040_v56 = vadd.f32 %v2039_v21, %v2015_v15  ;;  %v2274_v6 = vmul.f32 %v2248_v5, %v4628_v32  ;;  %v2462_v28 = vadd.f32 %v2461_v45, %v4562_v3  ;;  %v5121_v11 = vld [vmem:[#allocation20_spill] sm:$0xff]  ;;  %v2102_v42 = vmul.f32 %v2076_v63, %v4628_v32  ;;  %v2077_v15 = vld [vmem:[#allocation8 + $0x138] sm:$0xff] }
 0x1f2   : > { %v4651_v60 = vmax.f32 %v1939_v29, 0.0  ;;  %v1907_v4 = vmax.f32 %v1613_v19, %v1846_v2  ;;  %v5122_v29 = vld [vmem:[#allocation21_spill] sm:$0xff]  ;;  %v2125_v10 = vadd.f32 %v2124_v13, %v2100_v16  ;;  %v2213_v20 = vadd.f32 %v2212_v31, %v2188_v18  ;;  %v5124_v31 = vld [vmem:[#allocation22_spill] sm:$0xff] }
 0x1f3   : > { %v1555_v47 = vpop.f32.mrf.mxu0  ;;  %v1849_v1 = vpop.f32.mrf.mxu1  ;;  %v5123_v24 = vmax.f32 %v5121_v11, %v5122_v29  ;;  %v2298_v21 = vadd.f32 %v2297_v43, %v2273_v39  ;;  %v4663_v5 = vmul.f32 %v2420_v9, %v4628_v32  ;;  %v1992_v13 = vld [vmem:[#allocation8 + $0x70] sm:$0xff]  ;;  %v2463_v43 = vadd.f32 %v2462_v28, %v4599_v49  ;;  %v5125_v9 = vld [vmem:[#allocation23_spill] sm:$0xff] }
 0x1f4   : > { %v1940_v14 = vadd.f32 %v4480_v52, %v1907_v4  ;;  %v2189_v19 = vmul.f32 %v2163_v12, %v4651_v60  ;;  %v2017_v8 = vmul.f32 %v1991_v33, %v4651_v60  ;;  %v2126_v59 = vadd.f32 %v2125_v10, %v2101_v54  ;;  %v2421_v4 = vld [vmem:[#allocation8 + $0x478] sm:$0xff]  ;;  %v2250_v11 = vld [vmem:[#allocation8 + $0x2e0] sm:$0xff] }
 0x1f5   : > { %v1614_v2 = vmax.f32 %v5123_v24, %v1555_v47  ;;  %v3405_v41 = vpop.f32.mrf.mxu0  ;;  %v3465_v17 = vpop.f32.mrf.mxu1  ;;  %v2041_v47 = vadd.f32 %v2040_v56, %v2016_v34  ;;  %v2275_v12 = vmul.f32 %v2249_v26, %v4651_v60  ;;  %v2299_v18 = vadd.f32 %v2298_v21, %v2274_v6  ;;  %v2078_v29 = vld [vmem:[#allocation8 + $0x140] sm:$0xff] }
 0x1f6   : > { %v4665_v3 = vmax.f32 %v1940_v14, 0.0  ;;  %v5126_v14 = vmax.f32 %v5124_v31, %v5125_v9  ;;  %v2103_v54 = vmul.f32 %v2077_v15, %v4651_v60  ;;  %v2127_v33 = vadd.f32 %v2126_v59, %v2102_v42  ;;  %v2422_v26 = vld [vmem:[#allocation8 + $0x480] sm:$0xff]  ;;  %v2165_v41 = vld [vmem:[#allocation8 + $0x218] sm:$0xff]  ;;  %v2251_v59 = vld [vmem:[#allocation8 + $0x2e8] sm:$0xff] }
 0x1f7   : > { %v1908_v45 = vmax.f32 %v1614_v2, %v1849_v1  ;;  %v1560_v63 = vpop.f32.mrf.mxu0  ;;  %v1854_v16 = vpop.f32.mrf.mxu1  ;;  %v2214_v56 = vadd.f32 %v2213_v20, %v2189_v19  ;;  %v4677_v6 = vmul.f32 %v2421_v4, %v4651_v60  ;;  %v2464_v49 = vadd.f32 %v2463_v43, %v4606_v35  ;;  %v1993_v17 = vld [vmem:[#allocation8 + $0x78] sm:$0xff]  ;;  %v5128_v43 = vld [vmem:[#allocation25_spill] sm:$0xff] }
 0x1f8   : > { %v1615_v1 = vmax.f32 %v5126_v14, %v1560_v63  ;;  %v2190_v34 = vmul.f32 %v2164_v7, %v4665_v3  ;;  %v2018_v21 = vmul.f32 %v1992_v13, %v4665_v3  ;;  %v2042_v15 = vadd.f32 %v2041_v47, %v2017_v8  ;;  %v5127_v63 = vld [vmem:[#allocation24_spill] sm:$0xff] }
 0x1f9   : > { %v1941_v39 = vadd.f32 %v4480_v52, %v1908_v45  ;;  %v3408_v24 = vpop.f32.mrf.mxu0  ;;  %v3468_v2 = vpop.f32.mrf.mxu1  ;;  %v2276_v7 = vmul.f32 %v2250_v11, %v4665_v3  ;;  %v2300_v19 = vadd.f32 %v2299_v18, %v2275_v12  ;;  %v2104_v20 = vmul.f32 %v2078_v29, %v4665_v3  ;;  %v2079_v31 = vld [vmem:[#allocation8 + $0x148] sm:$0xff]  ;;  %v2166_v14 = vld [vmem:[#allocation8 + $0x220] sm:$0xff] }
 0x1fa   : > { %v1909_v10 = vmax.f32 %v1615_v1, %v1854_v16  ;;  %v2465_v4 = vadd.f32 %v2464_v49, %v4615_v36  ;;  %v5129_v16 = vmax.f32 %v5127_v63, %v5128_v43  ;;  %v2128_v9 = vadd.f32 %v2127_v33, %v2103_v54  ;;  %v2423_v36 = vld [vmem:[#allocation8 + $0x488] sm:$0xff]  ;;  %v1994_v2 = vld [vmem:[#allocation8 + $0x80] sm:$0xff] }
 0x1fb   : > { %v4680_v28 = vmax.f32 %v1941_v39, 0.0  ;;  %v1563_v42 = vpop.f32.mrf.mxu0  ;;  %v1857_v45 = vpop.f32.mrf.mxu1  ;;  %v4691_v8 = vmul.f32 %v2422_v26, %v4665_v3  ;;  %v2215_v18 = vadd.f32 %v2214_v56, %v2190_v34  ;;  %v2043_v49 = vadd.f32 %v2042_v15, %v2018_v21  ;;  %v2080_v21 = vld [vmem:[#allocation8 + $0x150] sm:$0xff] }
 0x1fc   : > { %v1942_v35 = vadd.f32 %v4480_v52, %v1909_v10  ;;  %v1616_v39 = vmax.f32 %v5129_v16, %v1563_v42  ;;  %v2466_v11 = vadd.f32 %v2465_v4, %v4622_v48  ;;  %v2252_v10 = vld [vmem:[#allocation8 + $0x2f0] sm:$0xff]  ;;  %v2301_v42 = vadd.f32 %v2300_v19, %v2276_v7  ;;  %v5131_v48 = vld [vmem:[#allocation27_spill] sm:$0xff]  ;;  %v2167_v19 = vld [vmem:[#allocation8 + $0x228] sm:$0xff] }
 0x1fd   : > { %v3409_v13 = vpop.f32.mrf.mxu0  ;;  %v3469_v47 = vpop.f32.mrf.mxu1  ;;  %v2191_v12 = vmul.f32 %v2165_v41, %v4680_v28  ;;  %v2019_v1 = vmul.f32 %v1993_v17, %v4680_v28  ;;  %v2277_v54 = vmul.f32 %v2251_v59, %v4680_v28  ;;  %v2105_v63 = vmul.f32 %v2079_v31, %v4680_v28  ;;  %v5130_v17 = vld [vmem:[#allocation26_spill] sm:$0xff] }
 0x1fe   : > { %v4696_v29 = vmax.f32 %v1942_v35, 0.0  ;;  %v1910_v24 = vmax.f32 %v1616_v39, %v1857_v45  ;;  %v2129_v41 = vadd.f32 %v2128_v9, %v2104_v20  ;;  %v2467_v34 = vadd.f32 %v2466_v11, %v4626_v53  ;;  %v2424_v15 = vld [vmem:[#allocation8 + $0x490] sm:$0xff]  ;;  %v1995_v13 = vld [vmem:[#allocation8 + $0x88] sm:$0xff]  ;;  %v2253_v47 = vld [vmem:[#allocation8 + $0x2f8] sm:$0xff] }
 0x1ff   : > { %v1568_v33 = vpop.f32.mrf.mxu0  ;;  %v1862_v26 = vpop.f32.mrf.mxu1  ;;  %v5132_v4 = vmax.f32 %v5130_v17, %v5131_v48  ;;  %v4707_v59 = vmul.f32 %v2423_v36, %v4680_v28  ;;  %v2216_v16 = vadd.f32 %v2215_v18, %v2191_v12  ;;  %v2044_v53 = vadd.f32 %v2043_v49, %v2019_v1  ;;  %v5133_v1 = vld [vmem:[#allocation28_spill] sm:$0xff] }
 0x200   : > { %v1943_v56 = vadd.f32 %v4480_v52, %v1910_v24  ;;  %v2192_v45 = vmul.f32 %v2166_v14, %v4696_v29  ;;  %v2020_v20 = vmul.f32 %v1994_v2, %v4696_v29  ;;  %v2468_v39 = vadd.f32 %v2467_v34, %v4633_v44  ;;  %v5134_v2 = vld [vmem:[#allocation29_spill] sm:$0xff] }
 0x201   : > { %v1617_v35 = vmax.f32 %v5132_v4, %v1568_v33  ;;  %v3412_v43 = vpop.f32.mrf.mxu0  ;;  %v3472_v7 = vpop.f32.mrf.mxu1  ;;  %v2278_v14 = vmul.f32 %v2252_v10, %v4696_v29  ;;  %v2302_v11 = vadd.f32 %v2301_v42, %v2277_v54  ;;  %v2081_v33 = vld [vmem:[#allocation8 + $0x158] sm:$0xff]  ;;  %v2106_v17 = vmul.f32 %v2080_v21, %v4696_v29  ;;  %v2168_v4 = vld [vmem:[#allocation8 + $0x230] sm:$0xff] }
 0x202   : > { %v4711_v31 = vmax.f32 %v1943_v56, 0.0  ;;  %v2130_v48 = vadd.f32 %v2129_v41, %v2105_v63  ;;  %v4716_v12 = vmul.f32 %v2424_v15, %v4696_v29  ;;  %v2469_v18 = vadd.f32 %v2468_v39, %v4643_v22  ;;  %v2425_v42 = vld [vmem:[#allocation8 + $0x498] sm:$0xff]  ;;  %v2254_v7 = vld [vmem:[#allocation8 + $0x300] sm:$0xff] }
 0x203   : > { %v1911_v9 = vmax.f32 %v1617_v35, %v1862_v26  ;;  %v1571_v24 = vpop.f32.mrf.mxu0  ;;  %v1865_v36 = vpop.f32.mrf.mxu1  ;;  %v5135_v49 = vmax.f32 %v5133_v1, %v5134_v2  ;;  %v2217_v54 = vadd.f32 %v2216_v16, %v2192_v45  ;;  %v1996_v35 = vld [vmem:[#allocation8 + $0x90] sm:$0xff]  ;;  %v2045_v41 = vadd.f32 %v2044_v53, %v2020_v20 }
 0x204   : > { %v2193_v10 = vmul.f32 %v2167_v19, %v4711_v31  ;;  %v2021_v63 = vmul.f32 %v1995_v13, %v4711_v31  ;;  %v2279_v21 = vmul.f32 %v2253_v47, %v4711_v31  ;;  %v2470_v22 = vadd.f32 %v2469_v18, %v4649_v40  ;;  %v5136_v40 = vld [vmem:[#allocation30_spill] sm:$0xff]  ;;  %v5137_v13 = vld [vmem:[#allocation31_spill] sm:$0xff] }
 0x205   : > { %v1944_v44 = vadd.f32 %v4480_v52, %v1911_v9  ;;  %v1618_v26 = vmax.f32 %v5135_v49, %v1571_v24  ;;  %v3413_v34 = vpop.f32.mrf.mxu0  ;;  %v3473_v56 = vpop.f32.mrf.mxu1  ;;  %v2303_v39 = vadd.f32 %v2302_v11, %v2278_v14  ;;  %v2107_v19 = vmul.f32 %v2081_v33, %v4711_v31  ;;  %v2082_v24 = vld [vmem:[#allocation8 + $0x160] sm:$0xff]  ;;  %v2169_v49 = vld [vmem:[#allocation8 + $0x238] sm:$0xff] }
 0x206   : > { %v2218_v9 = vadd.f32 %v2217_v54, %v2193_v10  ;;  %v2131_v1 = vadd.f32 %v2130_v48, %v2106_v17  ;;  %v4731_v2 = vmul.f32 %v2425_v42, %v4711_v31  ;;  %v2471_v20 = vadd.f32 %v2470_v22, %v4663_v5  ;;  %v2426_v33 = vld [vmem:[#allocation8 + $0x4a0] sm:$0xff]  ;;  %v1997_v17 = vld [vmem:[#allocation8 + $0x98] sm:$0xff]  ;;  %v2255_v34 = vld [vmem:[#allocation8 + $0x308] sm:$0xff] }
 0x207   : > { %v4727_v15 = vmax.f32 %v1944_v44, 0.0  ;;  %v1912_v43 = vmax.f32 %v1618_v26, %v1865_v36  ;;  %v1576_v45 = vpop.f32.mrf.mxu0  ;;  %v1870_v16 = vpop.f32.mrf.mxu1  ;;  %v5138_v47 = vmax.f32 %v5136_v40, %v5137_v13  ;;  %v2046_v48 = vadd.f32 %v2045_v41, %v2021_v63  ;;  %v2083_v56 = vld [vmem:[#allocation8 + $0x168] sm:$0xff] }
 0x208   : > { %v2304_v10 = vadd.f32 %v2303_v39, %v2279_v21  ;;  %v2472_v5 = vadd.f32 %v2471_v20, %v4677_v6  ;;  %v2132_v22 = vadd.f32 %v2131_v1, %v2107_v19  ;;  %v2427_v13 = vld [vmem:[#allocation8 + $0x4a8] sm:$0xff] }
 0x209   : > { %v1945_v53 = vadd.f32 %v4480_v52, %v1912_v43  ;;  %v1619_v36 = vmax.f32 %v5138_v47, %v1576_v45  ;;  %v2194_v14 = vmul.f32 %v2168_v4, %v4727_v15  ;;  %v2022_v11 = vmul.f32 %v1996_v35, %v4727_v15  ;;  %v3416_v18 = vpop.f32.mrf.mxu0  ;;  %v3476_v44 = vpop.f32.mrf.mxu1  ;;  %v5139_v6 = vld [vmem:[#allocation32_spill] sm:$0xff] }
 0x20a   : > { %v2280_v26 = vmul.f32 %v2254_v7, %v4727_v15  ;;  %v2108_v4 = vmul.f32 %v2082_v24, %v4727_v15  ;;  %v2452_v63 = vmul.f32 %v2426_v33, %v4727_v15  ;;  %v2473_v41 = vadd.f32 %v2472_v5, %v4691_v8  ;;  %v5140_v7 = vld [vmem:[#allocation33_spill] sm:$0xff] }
 0x20b   : > { %v4742_v54 = vmax.f32 %v1945_v53, 0.0  ;;  %v1913_v42 = vmax.f32 %v1619_v36, %v1870_v16  ;;  %v1579_v35 = vpop.f32.mrf.mxu0  ;;  %v1873_v43 = vpop.f32.mrf.mxu1  ;;  %v2219_v45 = vadd.f32 %v2218_v9, %v2194_v14  ;;  %v2047_v40 = vadd.f32 %v2046_v48, %v2022_v11  ;;  %v2170_v53 = vld [vmem:[#allocation8 + $0x240] sm:$0xff]  ;;  %v2256_v18 = vld [vmem:[#allocation8 + $0x310] sm:$0xff] }
 0x20c   : > { %v5141_v39 = vmax.f32 %v5139_v6, %v5140_v7  ;;  %v1998_v9 = vld [vmem:[#allocation8 + $0xa0] sm:$0xff]  ;;  %v2305_v36 = vadd.f32 %v2304_v10, %v2280_v26  ;;  %v2474_v8 = vadd.f32 %v2473_v41, %v4707_v59  ;;  %v2084_v44 = vld [vmem:[#allocation8 + $0x170] sm:$0xff]  ;;  %v2133_v48 = vadd.f32 %v2132_v22, %v2108_v4  ;;  %v2171_v7 = vld [vmem:[#allocation8 + $0x248] sm:$0xff] }
 0x20d   : > { %v1946_v21 = vadd.f32 %v4480_v52, %v1913_v42  ;;  %v2195_v20 = vmul.f32 %v2169_v49, %v4742_v54  ;;  %v2023_v24 = vmul.f32 %v1997_v17, %v4742_v54  ;;  %v3417_v19 = vpop.f32.mrf.mxu0  ;;  %v3477_v1 = vpop.f32.mrf.mxu1  ;;  %v2281_v47 = vmul.f32 %v2255_v34, %v4742_v54  ;;  %v5142_v10 = vld [vmem:[#allocation34_spill] sm:$0xff] }
 0x20e   : > { %v1620_v16 = vmax.f32 %v5141_v39, %v1579_v35  ;;  %v2109_v14 = vmul.f32 %v2083_v56, %v4742_v54  ;;  %v2453_v49 = vmul.f32 %v2427_v13, %v4742_v54  ;;  %v2475_v34 = vadd.f32 %v2474_v8, %v4716_v12  ;;  %v5143_v56 = vld [vmem:[#allocation35_spill] sm:$0xff]  ;;  %v2428_v4 = vld [vmem:[#allocation8 + $0x4b0] sm:$0xff]  ;;  %v1999_v39 = vld [vmem:[#allocation8 + $0xa8] sm:$0xff] }
 0x20f   : > { %v4756_v11 = vmax.f32 %v1946_v21, 0.0  ;;  %v1584_v17 = vpop.f32.mrf.mxu0  ;;  %v1878_v5 = vpop.f32.mrf.mxu1  ;;  %v2220_v42 = vadd.f32 %v2219_v45, %v2195_v20  ;;  %v2048_v35 = vadd.f32 %v2047_v40, %v2023_v24  ;;  %v2306_v6 = vadd.f32 %v2305_v36, %v2281_v47  ;;  %v2257_v1 = vld [vmem:[#allocation8 + $0x318] sm:$0xff] }
 0x210   : > { %v1914_v33 = vmax.f32 %v1620_v16, %v1873_v43  ;;  %v5144_v59 = vmax.f32 %v5142_v10, %v5143_v56  ;;  %v2134_v12 = vadd.f32 %v2133_v48, %v2109_v14  ;;  %v4772_v10 = vld [vmem:[#allocation6] ss:$0 sm:$0xff]  ;;  %v2172_v56 = vld [vmem:[#allocation8 + $0x250] sm:$0xff] }
 0x211   : > { %v2196_v43 = vmul.f32 %v2170_v53, %v4756_v11  ;;  %v2024_v21 = vmul.f32 %v1998_v9, %v4756_v11  ;;  %v3420_v22 = vpop.f32.mrf.mxu0  ;;  %v3480_v13 = vpop.f32.mrf.mxu1  ;;  %v2282_v45 = vmul.f32 %v2256_v18, %v4756_v11  ;;  %v2110_v40 = vmul.f32 %v2084_v44, %v4756_v11  ;;  %v2085_v53 = vld [vmem:[#allocation8 + $0x178] sm:$0xff]  ;;  %v5146_v44 = vld [vmem:[#allocation37_spill] sm:$0xff] }
 0x212   : > { %v1947_v26 = vadd.f32 %v4480_v52, %v1914_v33  ;;  %v1621_v41 = vmax.f32 %v5144_v59, %v1584_v17  ;;  %v2476_v52 = vadd.f32 %v2475_v34, %v4731_v2  ;;  %v2429_v9 = vld [vmem:[#allocation8 + $0x4b8] sm:$0xff]  ;;  %v2454_v17 = vmul.f32 %v2428_v4, %v4756_v11  ;;  %v5145_v2 = vld [vmem:[#allocation36_spill] sm:$0xff] }
 0x213   : > { %v2221_v24 = vadd.f32 %v2220_v42, %v2196_v43  ;;  %v2049_v19 = vadd.f32 %v2048_v35, %v2024_v21  ;;  %v1587_v47 = vpop.f32.mrf.mxu0  ;;  %v1881_v36 = vpop.f32.mrf.mxu1  ;;  %v2307_v8 = vadd.f32 %v2306_v6, %v2282_v45  ;;  %v2135_v33 = vadd.f32 %v2134_v12, %v2110_v40  ;;  %v2000_v6 = vld [vmem:[#allocation8 + $0xb0] sm:$0xff]  ;;  %v2258_v45 = vld [vmem:[#allocation8 + $0x320] sm:$0xff] }
 0x214   : > { %v4769_v16 = vmax.f32 %v1947_v26, 0.0  ;;  %v1915_v20 = vmax.f32 %v1621_v41, %v1878_v5  ;;  %v2477_v18 = vadd.f32 %v2476_v52, %v2452_v63  ;;  %v5147_v48 = vmax.f32 %v5145_v2, %v5146_v44  ;;  %v2430_v40 = vld [vmem:[#allocation8 + $0x4c0] sm:$0xff]  ;;  %v5148_v2 = vld [vmem:[#allocation38_spill] sm:$0xff] }
 0x215   : > { %v3421_v34 = vpop.f32.mrf.mxu0  ;;  %v3481_v26 = vpop.f32.mrf.mxu1 }
 0x216   : > { %v1948_v14 = vadd.f32 %v4772_v10, %v1915_v20  ;;  %v1622_v5 = vmax.f32 %v5147_v48, %v1587_v47  ;;  %v2197_v42 = vmul.f32 %v2171_v7, %v4769_v16  ;;  %v2025_v35 = vmul.f32 %v1999_v39, %v4769_v16  ;;  %v2086_v7 = vld [vmem:[#allocation8 + $0x180] sm:$0xff]  ;;  %v2259_v26 = vld [vmem:[#allocation8 + $0x328] sm:$0xff] }
 0x217   : > { %v2283_v59 = vmul.f32 %v2257_v1, %v4769_v16  ;;  %v2111_v63 = vmul.f32 %v2085_v53, %v4769_v16  ;;  %v2455_v41 = vmul.f32 %v2429_v9, %v4769_v16  ;;  %v2478_v43 = vadd.f32 %v2477_v18, %v2453_v49  ;;  %v1592_v39 = vpop.f32.mrf.mxu0  ;;  %v1886_v12 = vpop.f32.mrf.mxu1  ;;  %v5149_v53 = vld [vmem:[#allocation39_spill] sm:$0xff] }
 0x218   : > { %v4783_v21 = vmax.f32 %v1948_v14, 0.0  ;;  %v1916_v4 = vmax.f32 %v1622_v5, %v1881_v36  ;;  %v2222_v22 = vadd.f32 %v2221_v24, %v2197_v42  ;;  %v2050_v13 = vadd.f32 %v2049_v19, %v2025_v35  ;;  %v2173_v18 = vld [vmem:[#allocation8 + $0x258] sm:$0xff] }
 0x219   : > { %v2308_v52 = vadd.f32 %v2307_v8, %v2283_v59  ;;  %v2136_v20 = vadd.f32 %v2135_v33, %v2111_v63  ;;  %v2479_v47 = vadd.f32 %v2478_v43, %v2454_v17  ;;  %v5150_v44 = vmax.f32 %v5148_v2, %v5149_v53  ;;  %v3424_v24 = vpop.f32.mrf.mxu0  ;;  %v3484_v19 = vpop.f32.mrf.mxu1  ;;  %v2001_v14 = vld [vmem:[#allocation8 + $0xb8] sm:$0xff]  ;;  %v2431_v59 = vld [vmem:[#allocation8 + $0x4c8] sm:$0xff] }
 0x21a   : > { %v1949_v1 = vadd.f32 %v4772_v10, %v1916_v4  ;;  %v2198_v49 = vmul.f32 %v2172_v56, %v4783_v21  ;;  %v2026_v36 = vmul.f32 %v2000_v6, %v4783_v21  ;;  %v2284_v48 = vmul.f32 %v2258_v45, %v4783_v21  ;;  %v2087_v56 = vld [vmem:[#allocation8 + $0x188] sm:$0xff] }
 0x21b   : > { %v1623_v9 = vmax.f32 %v5150_v44, %v1592_v39  ;;  %v2112_v8 = vmul.f32 %v2086_v7, %v4783_v21  ;;  %v2456_v33 = vmul.f32 %v2430_v40, %v4783_v21  ;;  %v2480_v17 = vadd.f32 %v2479_v47, %v2455_v41  ;;  %v1595_v6 = vpop.f32.mrf.mxu0  ;;  %v1889_v63 = vpop.f32.mrf.mxu1  ;;  %v5151_v2 = vld [vmem:[#allocation40_spill] sm:$0xff]  ;;  %v5152_v7 = vld [vmem:[#allocation41_spill] sm:$0xff] }
 0x21c   : > { %v4794_v5 = vmax.f32 %v1949_v1, 0.0  ;;  %v2223_v35 = vadd.f32 %v2222_v22, %v2198_v49  ;;  %v2051_v34 = vadd.f32 %v2050_v13, %v2026_v36  ;;  %v2309_v43 = vadd.f32 %v2308_v52, %v2284_v48  ;;  %v2174_v47 = vld [vmem:[#allocation8 + $0x260] sm:$0xff]  ;;  %v2260_v44 = vld [vmem:[#allocation8 + $0x330] sm:$0xff] }
 0x21d   : > { %v1917_v42 = vmax.f32 %v1623_v9, %v1886_v12  ;;  %v2137_v4 = vadd.f32 %v2136_v20, %v2112_v8  ;;  %v2481_v39 = vadd.f32 %v2480_v17, %v2456_v33  ;;  %v5153_v53 = vmax.f32 %v5151_v2, %v5152_v7  ;;  %v3425_v22 = vpop.f32.mrf.mxu0  ;;  %v3485_v13 = vpop.f32.mrf.mxu1  ;;  %v2002_v1 = vld [vmem:[#allocation8 + $0xc0] sm:$0xff]  ;;  %v2088_v48 = vld [vmem:[#allocation8 + $0x190] sm:$0xff]  ;;  %v2261_v2 = vld [vmem:[#allocation8 + $0x338] sm:$0xff] }
 0x21e   : > { %v2199_v41 = vmul.f32 %v2173_v18, %v4794_v5  ;;  %v2027_v12 = vmul.f32 %v2001_v14, %v4794_v5  ;;  %v2285_v9 = vmul.f32 %v2259_v26, %v4794_v5  ;;  %v2113_v52 = vmul.f32 %v2087_v56, %v4794_v5  ;;  %v2432_v18 = vld [vmem:[#allocation8 + $0x4d0] sm:$0xff] }
 0x21f   : > { %v1950_v45 = vadd.f32 %v4772_v10, %v1917_v42  ;;  %v1624_v40 = vmax.f32 %v5153_v53, %v1595_v6  ;;  %v2457_v20 = vmul.f32 %v2431_v59, %v4794_v5  ;;  %v2324_v17 = vld [vmem:[#allocation8 + $0x350] sm:$0xff]  ;;  %v2175_v6 = vld [vmem:[#allocation8 + $0x268] sm:$0xff]  ;;  %v2433_v53 = vld [vmem:[#allocation8 + $0x4d8] sm:$0xff] }
 0x220   : > { %v2224_v24 = vadd.f32 %v2223_v35, %v2199_v41  ;;  %v2052_v19 = vadd.f32 %v2051_v34, %v2027_v12  ;;  %v2310_v8 = vadd.f32 %v2309_v43, %v2285_v9  ;;  %v2138_v14 = vadd.f32 %v2137_v4, %v2113_v52  ;;  %v2325_v43 = vld [vmem:[#allocation8 + $0x358] sm:$0xff] }
 0x221   : > { %v4805_v49 = vmax.f32 %v1950_v45, 0.0  ;;  %v1918_v36 = vmax.f32 %v1624_v40, %v1889_v63  ;;  %v2482_v33 = vadd.f32 %v2481_v39, %v2457_v20  ;;  %v2003_v45 = vld [vmem:[#allocation8 + $0xc8] sm:$0xff]  ;;  %v2089_v63 = vld [vmem:[#allocation8 + $0x198] sm:$0xff]  ;;  %v2350_v40 = vmul.f32 %v2324_v17, %v4509_v61 }
 0x222   : > { %v2351_v9 = vmul.f32 %v2325_v43, %v4519_v46  ;;  %v2329_v43 = vld [vmem:[#allocation8 + $0x378] sm:$0xff] }
 0x223   : > { %v1951_v42 = vadd.f32 %v4772_v10, %v1918_v36  ;;  %v2200_v26 = vmul.f32 %v2174_v47, %v4805_v49  ;;  %v2028_v56 = vmul.f32 %v2002_v1, %v4805_v49  ;;  %v2286_v59 = vmul.f32 %v2260_v44, %v4805_v49  ;;  %v2326_v44 = vld [vmem:[#allocation8 + $0x360] sm:$0xff] }
 0x224   : > { %v2114_v35 = vmul.f32 %v2088_v48, %v4805_v49  ;;  %v2458_v34 = vmul.f32 %v2432_v18, %v4805_v49  ;;  %v2327_v48 = vld [vmem:[#allocation8 + $0x368] sm:$0xff] }
 0x225   : > { %v4813_v4 = vmax.f32 %v1951_v42, 0.0  ;;  %v2225_v39 = vadd.f32 %v2224_v24, %v2200_v26  ;;  %v2053_v7 = vadd.f32 %v2052_v19, %v2028_v56  ;;  %v2311_v10 = vadd.f32 %v2310_v8, %v2286_v59  ;;  %v2328_v26 = vld [vmem:[#allocation8 + $0x370] sm:$0xff] }
 0x226   : > { %v2139_v41 = vadd.f32 %v2138_v14, %v2114_v35  ;;  %v2483_v12 = vadd.f32 %v2482_v33, %v2458_v34  ;;  %v2352_v8 = vmul.f32 %v2326_v44, %v4525_v50  ;;  %v2375_v14 = vadd.f32 %v4493_v37, %v2350_v40 }
 0x227   : > { %v2201_v22 = vmul.f32 %v2175_v6, %v4813_v4  ;;  %v2029_v13 = vmul.f32 %v2003_v45, %v4813_v4  ;;  %v2287_v47 = vmul.f32 %v2261_v2, %v4813_v4  ;;  %v2115_v1 = vmul.f32 %v2089_v63, %v4813_v4 }
 0x228   : > { %v2459_v52 = vmul.f32 %v2433_v53, %v4813_v4  ;;  %v2353_v59 = vmul.f32 %v2327_v48, %v4536_v55  ;;  %v2376_v45 = vadd.f32 %v2375_v14, %v2351_v9 }
 0x229   : > { %v2226_v20 = vadd.f32 %v2225_v39, %v2201_v22  ;;  %v2054_v36 = vadd.f32 %v2053_v7, %v2029_v13  ;;  %v2312_v24 = vadd.f32 %v2311_v10, %v2287_v47  ;;  %v2140_v19 = vadd.f32 %v2139_v41, %v2115_v1  ;;  %v2582_v1 = vld [vmem:[#allocation8 + $0x5c0] sm:$0xff] }
 0x22a   : > { %v2484_v18 = vadd.f32 %v2483_v12, %v2459_v52  ;;  %v2354_v7 = vmul.f32 %v2328_v26, %v4541_v51  ;;  %v2377_v10 = vadd.f32 %v2376_v45, %v2352_v8  ;;  %v2330_v12 = vld [vmem:[#allocation8 + $0x380] sm:$0xff]  ;;  %v2355_v13 = vmul.f32 %v2329_v43, %v4549_v58  ;;  %v2332_v8 = vld [vmem:[#allocation8 + $0x390] sm:$0xff] }
 0x22b   : > { %v2227_v33 = vrot.slane %v2226_v20, 4  ;;  %v2055_v17 = vrot.slane %v2054_v36, 4  ;;  %v2313_v42 = vrot.slane %v2312_v24, 4  ;;  %v2141_v6 = vrot.slane %v2140_v19, 4 }
 0x22c   : > { %v2485_v56 = vrot.slane %v2484_v18, 4  ;;  %v2378_v47 = vadd.f32 %v2377_v10, %v2353_v59  ;;  %v2608_v14 = vmul.f32 %v2582_v1, %v4509_v61 }
 0x22d   : > { %v2228_v2 = vadd.f32 %v2227_v33, %v2226_v20  ;;  %v2056_v63 = vadd.f32 %v2055_v17, %v2054_v36  ;;  %v2314_v35 = vadd.f32 %v2313_v42, %v2312_v24  ;;  %v2142_v34 = vadd.f32 %v2141_v6, %v2140_v19  ;;  %v2331_v36 = vld [vmem:[#allocation8 + $0x388] sm:$0xff] }
 0x22e   : > { %v2486_v39 = vadd.f32 %v2485_v56, %v2484_v18  ;;  %v2356_v24 = vmul.f32 %v2330_v12, %v4565_v30  ;;  %v2379_v19 = vadd.f32 %v2378_v47, %v2354_v7  ;;  %v2583_v33 = vld [vmem:[#allocation8 + $0x5c8] sm:$0xff]  ;;  %v2357_v42 = vmul.f32 %v2331_v36, %v4578_v25  ;;  %v2334_v7 = vld [vmem:[#allocation8 + $0x3a0] sm:$0xff]  ;;  %v2496_v47 = vld [vmem:[#allocation8 + $0x4f0] sm:$0xff] }
 0x22f   : > { %v2229_v53 = vrot.slane %v2228_v2, 2  ;;  %v2057_v37 = vrot.slane %v2056_v63, 2  ;;  %v2315_v40 = vrot.slane %v2314_v35, 2  ;;  %v2143_v41 = vrot.slane %v2142_v34, 2  ;;  %v2668_v36 = vld [vmem:[#allocation8 + $0x690] sm:$0xff] }
 0x230   : > { %v2487_v22 = vrot.slane %v2486_v39, 2  ;;  %v2380_v6 = vadd.f32 %v2379_v19, %v2355_v13  ;;  %v2609_v43 = vmul.f32 %v2583_v33, %v4519_v46  ;;  %v2633_v13 = vadd.f32 %v4499_v62, %v2608_v14  ;;  %v2587_v33 = vld [vmem:[#allocation8 + $0x5e8] sm:$0xff]  ;;  %v2669_v14 = vld [vmem:[#allocation8 + $0x698] sm:$0xff] }
 0x231   : > { %v2230_v44 = vadd.f32 %v2229_v53, %v2228_v2  ;;  %v2058_v9 = vadd.f32 %v2057_v37, %v2056_v63  ;;  %v2316_v52 = vadd.f32 %v2315_v40, %v2314_v35  ;;  %v2144_v20 = vadd.f32 %v2143_v41, %v2142_v34  ;;  %v2333_v2 = vld [vmem:[#allocation8 + $0x398] sm:$0xff]  ;;  %v2584_v63 = vld [vmem:[#allocation8 + $0x5d0] sm:$0xff] }
 0x232   : > { %v2488_v17 = vadd.f32 %v2487_v22, %v2486_v39  ;;  %v2358_v35 = vmul.f32 %v2332_v8, %v4593_v57  ;;  %v2381_v34 = vadd.f32 %v2380_v6, %v2356_v24  ;;  %v2359_v10 = vmul.f32 %v2333_v2, %v4611_v27  ;;  %v2585_v53 = vld [vmem:[#allocation8 + $0x5d8] sm:$0xff]  ;;  %v2335_v22 = vld [vmem:[#allocation8 + $0x3a8] sm:$0xff]  ;;  %v2336_v24 = vld [vmem:[#allocation8 + $0x3b0] sm:$0xff] }
 0x233   : > { %v2231_v48 = vrot.slane %v2230_v44, 1  ;;  %v2059_v18 = vrot.slane %v2058_v9, 1  ;;  %v2317_v59 = vrot.slane %v2316_v52, 1  ;;  %v2145_v45 = vrot.slane %v2144_v20, 1  ;;  %v2497_v8 = vld [vmem:[#allocation8 + $0x4f8] sm:$0xff] }
 0x234   : > { %v2382_v39 = vadd.f32 %v2381_v34, %v2357_v42  ;;  %v2610_v37 = vmul.f32 %v2584_v63, %v4525_v50  ;;  %v2489_v12 = vrot.slane %v2488_v17, 1  ;;  %v2360_v1 = vmul.f32 %v2334_v7, %v4628_v32  ;;  %v2755_v42 = vld [vmem:[#allocation8 + $0x768] sm:$0xff]  ;;  %v2498_v34 = vld [vmem:[#allocation8 + $0x500] sm:$0xff] }
 0x235   : > { %v2232_v26 = vadd.f32 %v2231_v48, %v2230_v44  ;;  %v2060_v56 = vadd.f32 %v2059_v18, %v2058_v9  ;;  %v2318_v40 = vadd.f32 %v2317_v59, %v2316_v52  ;;  %v2146_v41 = vadd.f32 %v2145_v45, %v2144_v20  ;;  %v2586_v9 = vld [vmem:[#allocation8 + $0x5e0] sm:$0xff] }
 0x236   : > { %v2383_v44 = vadd.f32 %v2382_v39, %v2358_v35  ;;  %v2611_v19 = vmul.f32 %v2585_v53, %v4536_v55  ;;  %v2634_v48 = vadd.f32 %v2633_v13, %v2609_v43  ;;  %v2754_v18 = vld [vmem:[#allocation8 + $0x760] sm:$0xff]  ;;  %v2361_v52 = vmul.f32 %v2335_v22, %v4651_v60  ;;  %v2588_v35 = vld [vmem:[#allocation8 + $0x5f0] sm:$0xff]  ;;  %v2499_v13 = vld [vmem:[#allocation8 + $0x508] sm:$0xff] }
 0x237   : > { %2233 = vadd.xlane.f32.xlu1 %v2232_v26  ;;  %2061 = vadd.xlane.f32.xlu0 %v2060_v56  ;;  %v2522_v62 = vmul.f32 %v2496_v47, %v4509_v61  ;;  %v2490_v6 = vadd.f32 %v2489_v12, %v2488_v17  ;;  %v2337_v26 = vld [vmem:[#allocation8 + $0x3b8] sm:$0xff]  ;;  %v2612_v56 = vmul.f32 %v2586_v9, %v4541_v51  ;;  %v2339_v17 = vld [vmem:[#allocation8 + $0x3c8] sm:$0xff]  ;;  %v2340_v39 = vld [vmem:[#allocation8 + $0x3d0] sm:$0xff] }
 0x238   : > { %v2384_v20 = vadd.f32 %v2383_v44, %v2359_v10  ;;  %v2635_v59 = vadd.f32 %v2634_v48, %v2610_v37  ;;  %v4841_v45 = vmul.f32 %v2668_v36, %v4509_v61  ;;  %v2362_v2 = vmul.f32 %v2336_v24, %v4665_v3  ;;  %v2338_v10 = vld [vmem:[#allocation8 + $0x3c0] sm:$0xff]  ;;  %v2341_v47 = vld [vmem:[#allocation8 + $0x3d8] sm:$0xff]  ;;  %v2343_v44 = vld [vmem:[#allocation8 + $0x3e8] sm:$0xff] }
 0x239   : > { %v4845_v43 = vmul.f32 %v2754_v18, %v4509_v61  ;;  %v2523_v7 = vmul.f32 %v2497_v8, %v4519_v46  ;;  %v2613_v53 = vmul.f32 %v2587_v33, %v4549_v58  ;;  %v2363_v12 = vmul.f32 %v2337_v26, %v4680_v28  ;;  %v2589_v61 = vld [vmem:[#allocation8 + $0x5f8] sm:$0xff]  ;;  %v2344_v33 = vld [vmem:[#allocation8 + $0x3f0] sm:$0xff] }
 0x23a   : > { %v2385_v63 = vadd.f32 %v2384_v20, %v2360_v1  ;;  %v2636_v37 = vadd.f32 %v2635_v59, %v2611_v19  ;;  %v2342_v1 = vld [vmem:[#allocation8 + $0x3e0] sm:$0xff]  ;;  %v2614_v9 = vmul.f32 %v2588_v35, %v4565_v30  ;;  %v2524_v24 = vmul.f32 %v2498_v34, %v4525_v50  ;;  %v2500_v20 = vld [vmem:[#allocation8 + $0x510] sm:$0xff]  ;;  %v2501_v34 = vld [vmem:[#allocation8 + $0x518] sm:$0xff] }
 0x23b   : > { %2319 = vadd.xlane.f32.xlu1 %v2318_v40  ;;  %2147 = vadd.xlane.f32.xlu0 %v2146_v41  ;;  %v4850_v40 = vmul.f32 %v2669_v14, %v4519_v46  ;;  %v4853_v41 = vmul.f32 %v2755_v42, %v4519_v46  ;;  %v2547_v19 = vadd.f32 %v4497_v0, %v2522_v62  ;;  %v2345_v14 = vld [vmem:[#allocation8 + $0x3f8] sm:$0xff]  ;;  %v2346_v42 = vld [vmem:[#allocation8 + $0x400] sm:$0xff] }
 0x23c   : > { %v2386_v22 = vadd.f32 %v2385_v63, %v2361_v52  ;;  %v2637_v36 = vadd.f32 %v2636_v37, %v2612_v56  ;;  %v2364_v48 = vmul.f32 %v2338_v10, %v4696_v29  ;;  %v2365_v46 = vmul.f32 %v2339_v17, %v4711_v31  ;;  %v2590_v52 = vld [vmem:[#allocation8 + $0x600] sm:$0xff]  ;;  %v2347_v10 = vld [vmem:[#allocation8 + $0x408] sm:$0xff]  ;;  %v2592_v17 = vld [vmem:[#allocation8 + $0x610] sm:$0xff] }
 0x23d   : > { %5154 = vst [vmem:[#allocation16_spill] sm:$0xff] %v4850_v40  ;;  %v2366_v18 = vmul.f32 %v2340_v39, %v4727_v15  ;;  %v2525_v56 = vmul.f32 %v2499_v13, %v4536_v55  ;;  %v2548_v59 = vadd.f32 %v2547_v19, %v2523_v7  ;;  %v2367_v0 = vmul.f32 %v2341_v47, %v4742_v54  ;;  %v2593_v39 = vld [vmem:[#allocation8 + $0x618] sm:$0xff] }
 0x23e   : > { %v2387_v8 = vadd.f32 %v2386_v22, %v2362_v2  ;;  %v2638_v26 = vadd.f32 %v2637_v36, %v2613_v53  ;;  %v2368_v62 = vmul.f32 %v2342_v1, %v4756_v11  ;;  %v4867_v63 = vmul.f32 %v2343_v44, %v4769_v16  ;;  %v2591_v2 = vld [vmem:[#allocation8 + $0x608] sm:$0xff]  ;;  %v2594_v1 = vld [vmem:[#allocation8 + $0x620] sm:$0xff] }
 0x23f   : > { %2491 = vadd.xlane.f32.xlu1 %v2490_v6  ;;  %v2615_v6 = vmul.f32 %v2589_v61, %v4578_v25  ;;  %v2616_v37 = vmul.f32 %v2590_v52, %v4593_v57  ;;  %v2526_v53 = vmul.f32 %v2500_v20, %v4541_v51  ;;  %v2549_v61 = vadd.f32 %v2548_v59, %v2524_v24  ;;  %v2502_v44 = vld [vmem:[#allocation8 + $0x520] sm:$0xff]  ;;  %v2595_v36 = vld [vmem:[#allocation8 + $0x628] sm:$0xff]  ;;  %v2756_v24 = vld [vmem:[#allocation8 + $0x770] sm:$0xff] }
 0x240   : > { %v2388_v35 = vadd.f32 %v2387_v8, %v2363_v12  ;;  %v2639_v22 = vadd.f32 %v2638_v26, %v2614_v9  ;;  %v4872_v7 = vmul.f32 %v2344_v33, %v4783_v21  ;;  %v4875_v13 = vmul.f32 %v2345_v14, %v4794_v5  ;;  %v2596_v14 = vld [vmem:[#allocation8 + $0x630] sm:$0xff]  ;;  %v2597_v59 = vld [vmem:[#allocation8 + $0x638] sm:$0xff] }
 0x241   : > { %v4878_v47 = vmul.f32 %v2346_v42, %v4805_v49  ;;  %v2617_v19 = vmul.f32 %v2591_v2, %v4611_v27  ;;  %v2527_v9 = vmul.f32 %v2501_v34, %v4549_v58  ;;  %v2550_v52 = vadd.f32 %v2549_v61, %v2525_v56  ;;  %v2757_v34 = vld [vmem:[#allocation8 + $0x778] sm:$0xff]  ;;  %v2504_v61 = vld [vmem:[#allocation8 + $0x530] sm:$0xff] }
 0x242   : > { %v2389_v12 = vadd.f32 %v2388_v35, %v2364_v48  ;;  %v2640_v8 = vadd.f32 %v2639_v22, %v2615_v6  ;;  %v4883_v20 = vmul.f32 %v2347_v10, %v4813_v4  ;;  %v2618_v26 = vmul.f32 %v2592_v17, %v4628_v32  ;;  %v2503_v48 = vld [vmem:[#allocation8 + $0x528] sm:$0xff]  ;;  %v2598_v22 = vld [vmem:[#allocation8 + $0x640] sm:$0xff] }
 0x243   : > { %v2619_v42 = vmul.f32 %v2593_v39, %v4651_v60  ;;  %v2620_v35 = vmul.f32 %v2594_v1, %v4665_v3  ;;  %v2528_v6 = vmul.f32 %v2502_v44, %v4565_v30  ;;  %v2551_v2 = vadd.f32 %v2550_v52, %v2526_v53  ;;  %v2599_v39 = vld [vmem:[#allocation8 + $0x648] sm:$0xff]  ;;  %v2758_v44 = vld [vmem:[#allocation8 + $0x780] sm:$0xff]  ;;  %v2505_v52 = vld [vmem:[#allocation8 + $0x538] sm:$0xff] }
 0x244   : > { %5155 = vst [vmem:[#allocation17_spill] sm:$0xff] %v4883_v20  ;;  %v2390_v33 = vadd.f32 %v2389_v12, %v2365_v46  ;;  %v2641_v40 = vadd.f32 %v2640_v8, %v2616_v37  ;;  %v2621_v10 = vmul.f32 %v2595_v36, %v4680_v28  ;;  %v2782_v46 = vmul.f32 %v2756_v24, %v4525_v50  ;;  %v2600_v8 = vld [vmem:[#allocation8 + $0x650] sm:$0xff] }
 0x245   : > { %v2805_v17 = vadd.f32 %v4503_v38, %v4845_v43  ;;  %v2622_v12 = vmul.f32 %v2596_v14, %v4696_v29  ;;  %v2529_v37 = vmul.f32 %v2503_v48, %v4578_v25  ;;  %v2552_v1 = vadd.f32 %v2551_v2, %v2527_v9  ;;  %v2759_v14 = vld [vmem:[#allocation8 + $0x788] sm:$0xff]  ;;  %v2602_v48 = vld [vmem:[#allocation8 + $0x660] sm:$0xff] }
 0x246   : > { %v2391_v56 = vadd.f32 %v2390_v33, %v2366_v18  ;;  %v2642_v20 = vadd.f32 %v2641_v40, %v2617_v19  ;;  %v2623_v18 = vmul.f32 %v2597_v59, %v4711_v31  ;;  %v2783_v36 = vmul.f32 %v2757_v34, %v4536_v55  ;;  %v2601_v33 = vld [vmem:[#allocation8 + $0x658] sm:$0xff]  ;;  %v2506_v59 = vld [vmem:[#allocation8 + $0x540] sm:$0xff] }
 0x247   : > { %v2806_v24 = vadd.f32 %v2805_v17, %v4853_v41  ;;  %v4899_v38 = vmul.f32 %v2598_v22, %v4727_v15  ;;  %v2530_v40 = vmul.f32 %v2504_v61, %v4593_v57  ;;  %v2553_v19 = vadd.f32 %v2552_v1, %v2528_v6  ;;  %v2760_v61 = vld [vmem:[#allocation8 + $0x790] sm:$0xff] }
 0x248   : > { %v2392_v53 = vadd.f32 %v2391_v56, %v2367_v0  ;;  %v2643_v43 = vadd.f32 %v2642_v20, %v2618_v26  ;;  %v4903_v0 = vmul.f32 %v2599_v39, %v4742_v54  ;;  %v2784_v2 = vmul.f32 %v2758_v44, %v4541_v51  ;;  %v2603_v56 = vld [vmem:[#allocation8 + $0x668] sm:$0xff] }
 0x249   : > { %v2807_v34 = vadd.f32 %v2806_v24, %v2782_v46  ;;  %v4907_v41 = vmul.f32 %v2600_v8, %v4756_v11  ;;  %v2531_v20 = vmul.f32 %v2505_v52, %v4611_v27  ;;  %v2554_v26 = vadd.f32 %v2553_v19, %v2529_v37  ;;  %v2507_v39 = vld [vmem:[#allocation8 + $0x548] sm:$0xff]  ;;  %v2605_v46 = vld [vmem:[#allocation8 + $0x678] sm:$0xff] }
 0x24a   : > { %v2393_v9 = vadd.f32 %v2392_v53, %v2368_v62  ;;  %v2644_v22 = vadd.f32 %v2643_v43, %v2619_v42  ;;  %v2604_v62 = vld [vmem:[#allocation8 + $0x670] sm:$0xff]  ;;  %v4912_v17 = vmul.f32 %v2601_v33, %v4769_v16  ;;  %v2785_v1 = vmul.f32 %v2759_v14, %v4549_v58  ;;  %v2761_v37 = vld [vmem:[#allocation8 + $0x798] sm:$0xff]  ;;  %v2762_v43 = vld [vmem:[#allocation8 + $0x7a0] sm:$0xff] }
 0x24b   : > { %v2808_v44 = vadd.f32 %v2807_v34, %v2783_v36  ;;  %v4916_v53 = vmul.f32 %v2602_v48, %v4783_v21  ;;  %v2532_v42 = vmul.f32 %v2506_v59, %v4628_v32  ;;  %v2555_v52 = vadd.f32 %v2554_v26, %v2530_v40  ;;  %v2508_v33 = vld [vmem:[#allocation8 + $0x550] sm:$0xff]  ;;  %v2670_v59 = vld [vmem:[#allocation8 + $0x6a0] sm:$0xff]  ;;  %v2509_v34 = vld [vmem:[#allocation8 + $0x558] sm:$0xff] }
 0x24c   : > { %v2394_v6 = vadd.f32 %v2393_v9, %v4867_v63  ;;  %v2645_v8 = vadd.f32 %v2644_v22, %v2620_v35  ;;  %v4921_v63 = vmul.f32 %v2603_v56, %v4794_v5  ;;  %v2786_v19 = vmul.f32 %v2760_v61, %v4565_v30  ;;  %v2763_v56 = vld [vmem:[#allocation8 + $0x7a8] sm:$0xff] }
 0x24d   : > { %v2809_v14 = vadd.f32 %v2808_v44, %v2784_v2  ;;  %v4925_v36 = vmul.f32 %v2604_v62, %v4805_v49  ;;  %v2533_v35 = vmul.f32 %v2507_v39, %v4651_v60  ;;  %v2556_v48 = vadd.f32 %v2555_v52, %v2531_v20  ;;  %v2671_v62 = vld [vmem:[#allocation8 + $0x6a8] sm:$0xff]  ;;  %v2510_v39 = vld [vmem:[#allocation8 + $0x560] sm:$0xff]  ;;  %v2764_v44 = vld [vmem:[#allocation8 + $0x7b0] sm:$0xff] }
 0x24e   : > { %v2395_v24 = vadd.f32 %v2394_v6, %v4872_v7  ;;  %v2646_v9 = vadd.f32 %v2645_v8, %v2621_v10  ;;  %v4930_v7 = vmul.f32 %v2605_v46, %v4813_v4  ;;  %v2787_v22 = vmul.f32 %v2761_v37, %v4578_v25 }
 0x24f   : > { %v2810_v26 = vadd.f32 %v2809_v14, %v2785_v1  ;;  %v2534_v2 = vmul.f32 %v2508_v33, %v4665_v3  ;;  %v2557_v6 = vadd.f32 %v2556_v48, %v2532_v42  ;;  %v2788_v10 = vmul.f32 %v2762_v43, %v4593_v57  ;;  %v2672_v42 = vld [vmem:[#allocation8 + $0x6b0] sm:$0xff]  ;;  %v2511_v43 = vld [vmem:[#allocation8 + $0x568] sm:$0xff]  ;;  %v2765_v14 = vld [vmem:[#allocation8 + $0x7b8] sm:$0xff] }
 0x250   : > { %v2396_v40 = vadd.f32 %v2395_v24, %v4875_v13  ;;  %v2647_v61 = vadd.f32 %v2646_v9, %v2622_v12  ;;  %v2696_v46 = vmul.f32 %v2670_v59, %v4525_v50  ;;  %v2719_v8 = vadd.f32 %v4501_v23, %v4841_v45  ;;  %v5156_v24 = vld [vmem:[#allocation17_spill] sm:$0xff] }
 0x251   : > { %v2811_v13 = vadd.f32 %v2810_v26, %v2786_v19  ;;  %v2535_v1 = vmul.f32 %v2509_v34, %v4680_v28  ;;  %v2558_v12 = vadd.f32 %v2557_v6, %v2533_v35  ;;  %v2789_v37 = vmul.f32 %v2763_v56, %v4611_v27  ;;  %v5157_v19 = vld [vmem:[#allocation16_spill] sm:$0xff]  ;;  %v2673_v35 = vld [vmem:[#allocation8 + $0x6b8] sm:$0xff] }
 0x252   : > { %v2397_v20 = vadd.f32 %v2396_v40, %v4878_v47  ;;  %v2648_v52 = vadd.f32 %v2647_v61, %v2623_v18  ;;  %v2697_v9 = vmul.f32 %v2671_v62, %v4536_v55  ;;  %v2720_v48 = vadd.f32 %v2719_v8, %v5157_v19  ;;  %v2512_v40 = vld [vmem:[#allocation8 + $0x570] sm:$0xff]  ;;  %v2766_v34 = vld [vmem:[#allocation8 + $0x7c0] sm:$0xff]  ;;  %v2515_v19 = vld [vmem:[#allocation8 + $0x588] sm:$0xff] }
 0x253   : > { %v2812_v47 = vadd.f32 %v2811_v13, %v2787_v22  ;;  %v2536_v23 = vmul.f32 %v2510_v39, %v4696_v29  ;;  %v2559_v45 = vadd.f32 %v2558_v12, %v2534_v2  ;;  %v2790_v18 = vmul.f32 %v2764_v44, %v4628_v32  ;;  %v2674_v62 = vld [vmem:[#allocation8 + $0x6c0] sm:$0xff]  ;;  %v2513_v2 = vld [vmem:[#allocation8 + $0x578] sm:$0xff]  ;;  %v2767_v39 = vld [vmem:[#allocation8 + $0x7c8] sm:$0xff] }
 0x254   : > { %v2398_v33 = vadd.f32 %v2397_v20, %v5156_v24  ;;  %v2649_v50 = vadd.f32 %v2648_v52, %v4899_v38  ;;  %v2698_v26 = vmul.f32 %v2672_v42, %v4541_v51  ;;  %v2721_v61 = vadd.f32 %v2720_v48, %v2696_v46  ;;  %v2675_v52 = vld [vmem:[#allocation8 + $0x6c8] sm:$0xff]  ;;  %v2768_v42 = vld [vmem:[#allocation8 + $0x7d0] sm:$0xff]  ;;  %v2769_v48 = vld [vmem:[#allocation8 + $0x7d8] sm:$0xff] }
 0x255   : > { %v2813_v56 = vadd.f32 %v2812_v47, %v2788_v10  ;;  %v2537_v55 = vmul.f32 %v2511_v43, %v4711_v31  ;;  %v2560_v6 = vadd.f32 %v2559_v45, %v2535_v1  ;;  %v2791_v38 = vmul.f32 %v2765_v14, %v4651_v60  ;;  %v2514_v1 = vld [vmem:[#allocation8 + $0x580] sm:$0xff]  ;;  %v2676_v47 = vld [vmem:[#allocation8 + $0x6d0] sm:$0xff] }
 0x256   : > { %v2399_v59 = vrot.slane %v2398_v33, 4  ;;  %v2650_v22 = vadd.f32 %v2649_v50, %v4903_v0  ;;  %v2699_v13 = vmul.f32 %v2673_v35, %v4549_v58  ;;  %v2722_v8 = vadd.f32 %v2721_v61, %v2697_v9 }
 0x257   : > { %v2814_v44 = vadd.f32 %v2813_v56, %v2789_v37  ;;  %v2538_v51 = vmul.f32 %v2512_v40, %v4727_v15  ;;  %v2561_v46 = vadd.f32 %v2560_v6, %v2536_v23  ;;  %v2792_v0 = vmul.f32 %v2766_v34, %v4665_v3  ;;  %v2516_v34 = vld [vmem:[#allocation8 + $0x590] sm:$0xff]  ;;  %v2770_v6 = vld [vmem:[#allocation8 + $0x7e0] sm:$0xff] }
 0x258   : > { %v2400_v20 = vadd.f32 %v2399_v59, %v2398_v33  ;;  %v2651_v10 = vadd.f32 %v2650_v22, %v4907_v41  ;;  %v2700_v33 = vmul.f32 %v2674_v62, %v4565_v30  ;;  %v2723_v43 = vadd.f32 %v2722_v8, %v2698_v26  ;;  %v2677_v59 = vld [vmem:[#allocation8 + $0x6d8] sm:$0xff] }
 0x259   : > { %v2815_v24 = vadd.f32 %v2814_v44, %v2790_v18  ;;  %v2539_v58 = vmul.f32 %v2513_v2, %v4742_v54  ;;  %v2562_v14 = vadd.f32 %v2561_v46, %v2537_v55  ;;  %v2793_v41 = vmul.f32 %v2767_v39, %v4680_v28 }
 0x25a   : > { %v2401_v12 = vrot.slane %v2400_v20, 2  ;;  %v2652_v37 = vadd.f32 %v2651_v10, %v4912_v17  ;;  %v2701_v23 = vmul.f32 %v2675_v52, %v4578_v25  ;;  %v2724_v45 = vadd.f32 %v2723_v43, %v2699_v13  ;;  %v2771_v10 = vld [vmem:[#allocation8 + $0x7e8] sm:$0xff] }
 0x25b   : > { %v2816_v50 = vadd.f32 %v2815_v24, %v2791_v38  ;;  %v2540_v30 = vmul.f32 %v2514_v1, %v4756_v11  ;;  %v2563_v35 = vadd.f32 %v2562_v14, %v2538_v51  ;;  %v2794_v17 = vmul.f32 %v2768_v42, %v4696_v29  ;;  %v2678_v38 = vld [vmem:[#allocation8 + $0x6e0] sm:$0xff]  ;;  %v2772_v24 = vld [vmem:[#allocation8 + $0x7f0] sm:$0xff] }
 0x25c   : > { %v2402_v9 = vadd.f32 %v2401_v12, %v2400_v20  ;;  %v2653_v18 = vadd.f32 %v2652_v37, %v4916_v53  ;;  %v2702_v26 = vmul.f32 %v2676_v47, %v4593_v57  ;;  %v2725_v61 = vadd.f32 %v2724_v45, %v2700_v33  ;;  %v2517_v20 = vld [vmem:[#allocation8 + $0x598] sm:$0xff]  ;;  %v2518_v51 = vld [vmem:[#allocation8 + $0x5a0] sm:$0xff]  ;;  %v2519_v33 = vld [vmem:[#allocation8 + $0x5a8] sm:$0xff] }
 0x25d   : > { %v2817_v56 = vadd.f32 %v2816_v50, %v2792_v0  ;;  %v2541_v55 = vmul.f32 %v2515_v19, %v4769_v16  ;;  %v2564_v25 = vadd.f32 %v2563_v35, %v2539_v58  ;;  %v2795_v53 = vmul.f32 %v2769_v48, %v4711_v31  ;;  %v2681_v19 = vld [vmem:[#allocation8 + $0x6f8] sm:$0xff]  ;;  %v2774_v35 = vld [vmem:[#allocation8 + $0x800] sm:$0xff] }
 0x25e   : > { %v2403_v40 = vrot.slane %v2402_v9, 1  ;;  %v2654_v22 = vadd.f32 %v2653_v18, %v4921_v63  ;;  %v2703_v39 = vmul.f32 %v2677_v59, %v4611_v27  ;;  %v2726_v44 = vadd.f32 %v2725_v61, %v2701_v23  ;;  %v2679_v63 = vld [vmem:[#allocation8 + $0x6e8] sm:$0xff] }
 0x25f   : > { %v2818_v2 = vadd.f32 %v2817_v56, %v2793_v41  ;;  %v2542_v57 = vmul.f32 %v2516_v34, %v4783_v21  ;;  %v2565_v8 = vadd.f32 %v2564_v25, %v2540_v30  ;;  %v2796_v46 = vmul.f32 %v2770_v6, %v4727_v15  ;;  %v2775_v61 = vld [vmem:[#allocation8 + $0x808] sm:$0xff] }
 0x260   : > { %v2404_v62 = vadd.f32 %v2403_v40, %v2402_v9  ;;  %v2655_v13 = vadd.f32 %v2654_v22, %v4925_v36  ;;  %v2704_v52 = vmul.f32 %v2678_v38, %v4628_v32  ;;  %v2727_v12 = vadd.f32 %v2726_v44, %v2702_v26  ;;  %v2680_v36 = vld [vmem:[#allocation8 + $0x6f0] sm:$0xff]  ;;  %v2773_v32 = vld [vmem:[#allocation8 + $0x7f8] sm:$0xff]  ;;  %v2683_v22 = vld [vmem:[#allocation8 + $0x708] sm:$0xff] }
 0x261   : > { %v2819_v0 = vadd.f32 %v2818_v2, %v2794_v17  ;;  %v2543_v27 = vmul.f32 %v2517_v20, %v4794_v5  ;;  %v2566_v42 = vadd.f32 %v2565_v8, %v2541_v55  ;;  %v2797_v43 = vmul.f32 %v2771_v10, %v4742_v54  ;;  %v2682_v17 = vld [vmem:[#allocation8 + $0x700] sm:$0xff]  ;;  %v2684_v20 = vld [vmem:[#allocation8 + $0x710] sm:$0xff]  ;;  %v2777_v8 = vld [vmem:[#allocation8 + $0x818] sm:$0xff] }
 0x262   : > { %2405 = vadd.xlane.f32.xlu0 %v2404_v62  ;;  %v2656_v1 = vadd.f32 %v2655_v13, %v4930_v7  ;;  %v2705_v58 = vmul.f32 %v2679_v63, %v4651_v60  ;;  %v2728_v14 = vadd.f32 %v2727_v12, %v2703_v39  ;;  %v2544_v47 = vmul.f32 %v2518_v51, %v4805_v49  ;;  %v2776_v62 = vld [vmem:[#allocation8 + $0x810] sm:$0xff]  ;;  %v2685_v10 = vld [vmem:[#allocation8 + $0x718] sm:$0xff]  ;;  %v2686_v12 = vld [vmem:[#allocation8 + $0x720] sm:$0xff] }
 0x263   : > { %v2820_v37 = vadd.f32 %v2819_v0, %v2795_v53  ;;  %v2567_v9 = vadd.f32 %v2566_v42, %v2542_v57  ;;  %v2798_v7 = vmul.f32 %v2772_v24, %v4756_v11  ;;  %v2706_v50 = vmul.f32 %v2680_v36, %v4665_v3  ;;  %v2687_v36 = vld [vmem:[#allocation8 + $0x728] sm:$0xff] }
 0x264   : > { %v2657_v41 = vrot.slane %v2656_v1, 4  ;;  %v2729_v23 = vadd.f32 %v2728_v14, %v2704_v52  ;;  %v2545_v18 = vmul.f32 %v2519_v33, %v4813_v4  ;;  %v2799_v60 = vmul.f32 %v2773_v32, %v4769_v16  ;;  %v2688_v14 = vld [vmem:[#allocation8 + $0x730] sm:$0xff]  ;;  %v2689_v32 = vld [vmem:[#allocation8 + $0x738] sm:$0xff] }
 0x265   : > { %v2821_v48 = vadd.f32 %v2820_v37, %v2796_v46  ;;  %v2568_v30 = vadd.f32 %v2567_v9, %v2543_v27  ;;  %v2707_v40 = vmul.f32 %v2681_v19, %v4680_v28  ;;  %v2800_v55 = vmul.f32 %v2774_v35, %v4783_v21 }
 0x266   : > { %v2658_v45 = vadd.f32 %v2657_v41, %v2656_v1  ;;  %v2730_v34 = vadd.f32 %v2729_v23, %v2705_v58  ;;  %v2708_v25 = vmul.f32 %v2682_v17, %v4696_v29  ;;  %v2801_v2 = vmul.f32 %v2775_v61, %v4794_v5 }
 0x267   : > { %v2822_v59 = vadd.f32 %v2821_v48, %v2797_v43  ;;  %v2569_v26 = vadd.f32 %v2568_v30, %v2544_v47  ;;  %v2709_v28 = vmul.f32 %v2683_v22, %v4711_v31  ;;  %v2802_v63 = vmul.f32 %v2776_v62, %v4805_v49 }
 0x268   : > { %v2659_v56 = vrot.slane %v2658_v45, 2  ;;  %v2731_v6 = vadd.f32 %v2730_v34, %v2706_v50  ;;  %v2710_v29 = vmul.f32 %v2684_v20, %v4727_v15  ;;  %v2803_v1 = vmul.f32 %v2777_v8, %v4813_v4  ;;  %v2690_v50 = vld [vmem:[#allocation8 + $0x740] sm:$0xff] }
 0x269   : > { %v2823_v3 = vadd.f32 %v2822_v59, %v2798_v7  ;;  %v2570_v38 = vadd.f32 %v2569_v26, %v2545_v18  ;;  %v2711_v42 = vmul.f32 %v2685_v10, %v4742_v54  ;;  %v2712_v43 = vmul.f32 %v2686_v12, %v4756_v11  ;;  %v2691_v11 = vld [vmem:[#allocation8 + $0x748] sm:$0xff] }
 0x26a   : > { %v2660_v53 = vadd.f32 %v2659_v56, %v2658_v45  ;;  %v2732_v44 = vadd.f32 %v2731_v6, %v2707_v40  ;;  %v2713_v41 = vmul.f32 %v2687_v36, %v4769_v16  ;;  %v2714_v7 = vmul.f32 %v2688_v14, %v4783_v21 }
 0x26b   : > { %v2824_v39 = vadd.f32 %v2823_v3, %v2799_v60  ;;  %v2571_v57 = vrot.slane %v2570_v38, 4  ;;  %v2715_v45 = vmul.f32 %v2689_v32, %v4794_v5  ;;  %v2716_v35 = vmul.f32 %v2690_v50, %v4805_v49 }
 0x26c   : > { %v2661_v13 = vrot.slane %v2660_v53, 1  ;;  %v2733_v46 = vadd.f32 %v2732_v44, %v2708_v25  ;;  %v2717_v60 = vmul.f32 %v2691_v11, %v4813_v4 }
 0x26d   : > { %v2825_v51 = vadd.f32 %v2824_v39, %v2800_v55  ;;  %v2572_v52 = vadd.f32 %v2571_v57, %v2570_v38 }
 0x26e   : > { %v2662_v0 = vadd.f32 %v2661_v13, %v2660_v53  ;;  %v2734_v31 = vadd.f32 %v2733_v46, %v2709_v28 }
 0x26f   : > { %v2826_v27 = vadd.f32 %v2825_v51, %v2801_v2  ;;  %v2573_v24 = vrot.slane %v2572_v52, 2 }
 0x270   : > { %2663 = vadd.xlane.f32.xlu1 %v2662_v0  ;;  %v2735_v37 = vadd.f32 %v2734_v31, %v2710_v29 }
 0x271   : > { %v2827_v33 = vadd.f32 %v2826_v27, %v2802_v63  ;;  %v2574_v58 = vadd.f32 %v2573_v24, %v2572_v52  ;;  %v2855_v63 = vld [vmem:[#allocation9] sm:$0x1] }
 0x272   : > { %v2736_v47 = vadd.f32 %v2735_v37, %v2711_v42 }
 0x273   : > { %v2828_v15 = vadd.f32 %v2827_v33, %v2803_v1  ;;  %v2575_v9 = vrot.slane %v2574_v58, 1 }
 0x274   : > { %v2737_v54 = vadd.f32 %v2736_v47, %v2712_v43 }
 0x275   : > { %v2829_v19 = vrot.slane %v2828_v15, 4  ;;  %v2576_v48 = vadd.f32 %v2575_v9, %v2574_v58 }
 0x276   : > { %v2738_v18 = vadd.f32 %v2737_v54, %v2713_v41 }
 0x277   : > { %v2830_v23 = vadd.f32 %v2829_v19, %v2828_v15  ;;  %2577 = vadd.xlane.f32.xlu0 %v2576_v48 }
 0x278   : > { %v2739_v17 = vadd.f32 %v2738_v18, %v2714_v7 }
 0x279   : > { %v2831_v30 = vrot.slane %v2830_v23, 2 }
 0x27a   : > { %v2740_v59 = vadd.f32 %v2739_v17, %v2715_v45 }
 0x27b   : > { %v2832_v16 = vadd.f32 %v2831_v30, %v2830_v23 }
 0x27c   : > { %v2741_v34 = vadd.f32 %v2740_v59, %v2716_v35 }
 0x27d   : > { %v2833_v40 = vrot.slane %v2832_v16, 1 }
 0x27e   : > { %v2742_v56 = vadd.f32 %v2741_v34, %v2717_v60 }
 0x27f   : > { %v2834_v21 = vadd.f32 %v2833_v40, %v2832_v16 }
 0x280   : > { %v2743_v26 = vrot.slane %v2742_v56, 4 }
 0x281   : > { %2835 = vadd.xlane.f32.xlu1 %v2834_v21 }
 0x282   : > { %v2744_v61 = vadd.f32 %v2743_v26, %v2742_v56 }
 0x284   : > { %v2745_v22 = vrot.slane %v2744_v61, 2 }
 0x286   : > { %v2746_v5 = vadd.f32 %v2745_v22, %v2744_v61 }
 0x288   : > { %v2747_v55 = vrot.slane %v2746_v5, 1 }
 0x28a   : > { %v2748_v3 = vadd.f32 %v2747_v55, %v2746_v5 }
 0x28c   : > { %2749 = vadd.xlane.f32.xlu0 %v2748_v3 }
 0x2c0   : > { %v2234_v25 = vpop.xlane.xlu1 %2233  ;;  %v2062_v6 = vpop.xlane.xlu0 %2061 }
 0x2c4   : > { %v2320_v49 = vpop.xlane.xlu1 %2319  ;;  %v2148_v53 = vpop.xlane.xlu0 %2147 }
 0x2c5   : > { %v2838_v4 = vsel %vm2837_vm3, %v2062_v6, %v2148_v53 }
 0x2c6   : > { %v2840_v38 = vsel %vm2839_vm4, %v2838_v4, %v2234_v25 }
 0x2c7   : > { %v2842_v2 = vsel %vm2841_vm5, %v2840_v38, %v2320_v49 }
 0x2c8   : > { %v2492_v62 = vpop.xlane.xlu1 %2491 }
 0x2eb   : > { %v2406_v20 = vpop.xlane.xlu0 %2405 }
 0x2ec   : > { %v2844_v39 = vsel %vm2843_vm6, %v2842_v2, %v2406_v20 }
 0x2ed   : > { %v2846_v13 = vsel %vm2845_vm7, %v2844_v39, %v2492_v62 }
 0x2f9   : > { %v2664_v28 = vpop.xlane.xlu1 %2663 }
 0x300   : > { %v2578_v44 = vpop.xlane.xlu0 %2577 }
 0x301   : > { %v2848_v57 = vsel %vm2847_vm8, %v2846_v13, %v2578_v44 }
 0x302   : > { %v2850_v10 = vsel %vm2849_vm9, %v2848_v57, %v2664_v28 }
 0x30a   : > { %v2836_v8 = vpop.xlane.xlu1 %2835 }
 0x315   : > { %v2750_v51 = vpop.xlane.xlu0 %2749 }
 0x316   : > { %v2852_v29 = vsel %vm2851_vm10, %v2850_v10, %v2750_v51 }
 0x317   : > { %v2854_v46 = vsel %vm2853_vm11, %v2852_v29, %v2836_v8 }
 0x318   : > { %v2856_v0 = vadd.f32 %v2855_v63, %v2854_v46 }
 0x31a   : > { %2858 = vst.msk [vmem:[%s732_s17] sm:$0x1] %vm2857_vm12, %v2856_v0 }
 0x31b   : > { %3749 = shalt.err (!%p3746_p0)
}
 0x31c   : > { %s3750_s14 = scalar_lea.hbm %s2870_s7, 16  ;;  %s3754_s15 = scalar_lea.hbm %s5037_s5, 32 }
 0x31d   : > { %p3751_p1 = scmp.ne.s32.totalorder %s2870_s7, %s3750_s14  ;;  %p3755_p11 = scmp.lt.s32.totalorder %s2870_s7, %s5037_s5 }
 0x31e   : > { %p3756_p13 = scmp.lt.s32.totalorder %s3754_s15, %s3750_s14 }
 0x31f   : > { %p3752_p9 = pnand %p3751_p1, %p3895_p6 }
 0x320   : > { %p3757_p2 = por %p3756_p13, %p3755_p11 }
 0x321   : > { %p3753_p12 = pneg %p3752_p9 }
 0x323   : > { %p3758_p8 = pnand %p3757_p2, %p3753_p12 }
 0x325   : > { %3761 = shalt.err (!%p3758_p8)
}
 0x326   : > { %3504 = dma.vmem_to_hbm [thread:$0]  (%p3895_p6), %s2873_s23, 16, %s2870_s7, %s2860_s13  }
 0x327 PF: > { %s2884_s6 = sand.u32 1, %s3796_s18   ;;  %p5158_p7 = scmp.ge.s32.totalorder %s3808_s21, 2 }
 0x328   : > { %s2885_s17 = scalar_lea.sflag [#allocation5], %s2884_s6 }
 0x329   : > { %p3520_p3 = pnand %p5158_p7, %p3901_p10 }
 0x32b   : > { %p3521_p4 = pneg %p3520_p3 }
 0x32d   : > { %3791 = dma.done.wait (%p3521_p4), %s2885_s17, 16  }
 0x32e   : > { %3793 = vsyncadd (%p3521_p4), %s2885_s17, 4294967280  ;;  %p18_p8 = scmp.ge.s32.totalorder %s3877_s24, 4   ;;  %s5159_s18 = smov %s3800_s19 }
 0x32f   : > { %s5160_s19 = smov %s3804_s20  ;;  %s5161_s20 = smov %s3889_s27 }
 0x330   : > { %s5162_s21 = smov %s3877_s24  ;;  %20 = sbr.rel (!%p18_p8) target bundleno = 6 (0x6), region = 150 }
 0x335   :  { %2889 = vsyncpa [#allocation4], 1 }
 0x336   :  { %2891 = vsyncpa [#allocation4 + $0x1], 1 }
 0x337   :  { %2892 = vsyncpa [#allocation7], 1 }
 0x338   :  { %2893 = vsyncpa [#allocation10], 1 }
 0x339   :  { %2894 = vsyncpa [#allocation5], 1 }
 0x33a   :  { %2896 = vsyncpa [#allocation5 + $0x1], 1 }

</bundles_post_ra>
